<compile_context>
chip_gen: v7x
topology: tpu7x:2x2x1
jax: 0.10.0
libtpu: 0.0.40
codegen_flags: <defaults>
</compile_context>

<pallas_src>
import functools
import math

import jax
import jax.numpy as jnp
from jax.experimental import pallas as pl
from jax.experimental.pallas import tpu as pltpu


def _layernorm(v, alpha, bias, eps):
    # torch: mean over last dim; std is UNBIASED (divides by N-1); eps added to std.
    n = v.shape[-1]
    mean = jnp.mean(v, axis=-1, keepdims=True)
    var = jnp.sum((v - mean) ** 2, axis=-1, keepdims=True) * (1.0 / (n - 1))
    std = jnp.sqrt(var)
    return alpha * (v - mean) / (std + eps) + bias


def _encoder_block_kernel(
    x_ref, mask_ref,
    wqkv_ref, bqkv_ref, wo_ref, bo_ref,
    w1_ref, b1_ref, w2_ref, b2_ref,
    ln1_a_ref, ln1_b_ref, ln2_a_ref, ln2_b_ref,
    out_ref,
    *, n_heads, eps,
):
    b_tile, S, D = x_ref.shape
    d_k = D // n_heads
    BS = b_tile * S
    cdt = wqkv_ref.dtype                 # matmul operand dtype (bf16 or f32)

    # ---- load everything once; all math below is plain jnp on values ----
    x = x_ref[...].astype(jnp.float32).reshape(BS, D)
    mask_zero = mask_ref[...] == 0.0      # (b_tile, S, S) bool, hoisted out of head loop
    wqkv = wqkv_ref[...]
    bqkv = bqkv_ref[...].astype(jnp.float32)
    wo = wo_ref[...]
    bo = bo_ref[...].astype(jnp.float32)
    w1 = w1_ref[...]
    b1 = b1_ref[...].astype(jnp.float32)
    w2 = w2_ref[...]
    b2 = b2_ref[...].astype(jnp.float32)

    # ---------------- sublayer 1: pre-norm multi-head self-attention ----------------
    xn = _layernorm(x, ln1_a_ref[...], ln1_b_ref[...], eps)

    # Fused QKV projection: one (BS, D) @ (D, 3D) matmul, f32 accumulation.
    qkv = jnp.dot(xn.astype(cdt), wqkv, preferred_element_type=jnp.float32) + bqkv

    inv_sqrt_dk = jnp.float32(1.0 / math.sqrt(d_k))
    neg_fill = jnp.float32(-1e-09)        # literal masked_fill value of the spec

    attn = jnp.zeros((BS, D), jnp.float32)
    for h in range(n_heads):                                  # static unroll over heads
        c = h * d_k
        qh = qkv[:, c:c + d_k].reshape(b_tile, S, d_k)
        kh = qkv[:, D + c:D + c + d_k].reshape(b_tile, S, d_k)
        vh = qkv[:, 2 * D + c:2 * D + c + d_k].reshape(b_tile, S, d_k)

        # batched q @ k^T over the batch-tile dim, contracting last dims (no transpose)
        s = jnp.einsum("bqd,bkd->bqk", qh.astype(cdt), kh.astype(cdt),
                       preferred_element_type=jnp.float32) * inv_sqrt_dk
        s = jnp.where(mask_zero, neg_fill, s)

        m = jnp.max(s, axis=-1, keepdims=True)
        p = jnp.exp(s - m)
        p = p * (1.0 / jnp.sum(p, axis=-1, keepdims=True))    # dropout = identity (eval)

        pv = jnp.einsum("bqk,bkd->bqd", p.astype(cdt), vh.astype(cdt),
                        preferred_element_type=jnp.float32)    # (b_tile, S, d_k)

        # Fold this head straight through its slice of w_o:
        # sum_h head_h @ wo[h*d_k:(h+1)*d_k, :]  ==  concat(heads) @ wo
        attn = attn + jnp.dot(pv.reshape(BS, d_k).astype(cdt), wo[c:c + d_k, :],
                              preferred_element_type=jnp.float32)
    attn = attn + bo

    x1 = x + attn                                     # residual 1 (dropout = identity)

    # ---------------- sublayer 2: pre-norm feed-forward ----------------
    xn2 = _layernorm(x1, ln2_a_ref[...], ln2_b_ref[...], eps)
    hdn = jnp.dot(xn2.astype(cdt), w1, preferred_element_type=jnp.float32) + b1
    hdn = jnp.maximum(hdn, 0.0)                        # ReLU
    ff = jnp.dot(hdn.astype(cdt), w2, preferred_element_type=jnp.float32) + b2

    out_ref[...] = (x1 + ff).reshape(b_tile, S, D).astype(out_ref.dtype)


def _pick_b_tile(B, S, max_rows=512):
    """Largest divisor of B so that b_tile*S stays a reasonable sublane extent."""
    bt = max(1, min(B, max_rows // max(S, 1)))
    while B % bt:
        bt -= 1
    return bt


def encoder_block(x, mask, params, n_heads, eps=1e-6,
                  compute_dtype=jnp.float32, b_tile=None):
    B, S, D = x.shape
    d_ff = params["w1"].shape[1]
    assert D % n_heads == 0

    if b_tile is None:
        b_tile = _pick_b_tile(B, S)
    assert B % b_tile == 0
    grid = (B // b_tile,)

    cdt = jnp.dtype(compute_dtype)
    f32 = jnp.float32

    # Fuse Q/K/V weights into one (D, 3D) matmul; store weights in the matmul
    # compute dtype (halves weight VMEM for bf16). Biases / LN params stay f32.
    wqkv = jnp.concatenate([params["wq"], params["wk"], params["wv"]], axis=1).astype(cdt)
    bqkv = jnp.concatenate([params["bq"], params["bk"], params["bv"]], axis=1).astype(f32)
    wo = params["wo"].astype(cdt); bo = params["bo"].astype(f32)
    w1 = params["w1"].astype(cdt); b1 = params["b1"].astype(f32)
    w2 = params["w2"].astype(cdt); b2 = params["b2"].astype(f32)
    ln1_a = params["ln1_a"].astype(f32); ln1_b = params["ln1_b"].astype(f32)
    ln2_a = params["ln2_a"].astype(f32); ln2_b = params["ln2_b"].astype(f32)

    kernel = functools.partial(_encoder_block_kernel, n_heads=n_heads, eps=eps)

    def full2(shape):
        return pl.BlockSpec(shape, lambda b: (0, 0))

    per_seq = pl.BlockSpec((b_tile, S, D), lambda b: (b, 0, 0))
    per_mask = pl.BlockSpec((b_tile, S, S), lambda b: (b, 0, 0))

    in_specs = [
        per_seq,                                 # x
        per_mask,                                # mask
        full2((D, 3 * D)), full2((1, 3 * D)),    # fused QKV weight / bias
        full2((D, D)), full2((1, D)),            # w_o, b_o
        full2((D, d_ff)), full2((1, d_ff)),      # linear1
        full2((d_ff, D)), full2((1, D)),         # linear2
        full2((1, D)), full2((1, D)),            # ln1 alpha, bias
        full2((1, D)), full2((1, D)),            # ln2 alpha, bias
    ]

    return pl.pallas_call(
        kernel,
        out_shape=jax.ShapeDtypeStruct((B, S, D), x.dtype),
        grid_spec=pltpu.PrefetchScalarGridSpec(
            num_scalar_prefetch=0,
            grid=grid,
            in_specs=in_specs,
            out_specs=pl.BlockSpec((b_tile, S, D), lambda b: (b, 0, 0)),
        ),
        compiler_params=pltpu.CompilerParams(
            dimension_semantics=("parallel",),
            vmem_limit_bytes=48 * 1024 * 1024),
    )(x, mask, wqkv, bqkv, wo, bo, w1, b1, w2, b2,
      ln1_a, ln1_b, ln2_a, ln2_b)


# ----------------------- pure-JAX reference (for verification) -----------------------
_PREC = jax.lax.Precision.HIGHEST    # true-f32 matmuls so the f32 comparison is meaningful


def _ref_layernorm(v, alpha, bias, eps):
    n = v.shape[-1]
    mean = jnp.mean(v, axis=-1, keepdims=True)
    var = jnp.sum((v - mean) ** 2, axis=-1, keepdims=True) / (n - 1)
    std = jnp.sqrt(var)
    return alpha * (v - mean) / (std + eps) + bias


def encoder_block_ref(x, mask, params, n_heads, eps=1e-6):
    B, S, D = x.shape
    d_k = D // n_heads
    xn = _ref_layernorm(x, params["ln1_a"][0], params["ln1_b"][0], eps)
    q = jnp.einsum("bsd,de->bse", xn, params["wq"], precision=_PREC) + params["bq"][0]
    k = jnp.einsum("bsd,de->bse", xn, params["wk"], precision=_PREC) + params["bk"][0]
    v = jnp.einsum("bsd,de->bse", xn, params["wv"], precision=_PREC) + params["bv"][0]
    q = q.reshape(B, S, n_heads, d_k).transpose(0, 2, 1, 3)
    k = k.reshape(B, S, n_heads, d_k).transpose(0, 2, 1, 3)
    v = v.reshape(B, S, n_heads, d_k).transpose(0, 2, 1, 3)
    scores = jnp.einsum("bhqd,bhkd->bhqk", q, k, precision=_PREC) / math.sqrt(d_k)
    scores = jnp.where(mask[:, None, :, :] == 0, -1e-09, scores)
    attn = jax.nn.softmax(scores, axis=-1)
    o = jnp.einsum("bhqk,bhkd->bhqd", attn, v, precision=_PREC)
    o = o.transpose(0, 2, 1, 3).reshape(B, S, D)
    o = jnp.einsum("bsd,de->bse", o, params["wo"], precision=_PREC) + params["bo"][0]
    x1 = x + o
    xn2 = _ref_layernorm(x1, params["ln2_a"][0], params["ln2_b"][0], eps)
    h = jnp.maximum(
        jnp.einsum("bsd,df->bsf", xn2, params["w1"], precision=_PREC) + params["b1"][0], 0.0)
    ff = jnp.einsum("bsf,fd->bsd", h, params["w2"], precision=_PREC) + params["b2"][0]
    return x1 + ff


if __name__ == "__main__":
    B, S, D, H, D_FF = 2, 8, 32, 4, 64

    key = jax.random.PRNGKey(0)
    keys = jax.random.split(key, 12)

    def glorot(k, shape):
        fan_in = shape[0]
        return jax.random.normal(k, shape, jnp.float32) / math.sqrt(fan_in)

    params = {
        "wq": glorot(keys[0], (D, D)),     "bq": jax.random.normal(keys[1], (1, D)) * 0.02,
        "wk": glorot(keys[2], (D, D)),     "bk": jax.random.normal(keys[3], (1, D)) * 0.02,
        "wv": glorot(keys[4], (D, D)),     "bv": jax.random.normal(keys[5], (1, D)) * 0.02,
        "wo": glorot(keys[6], (D, D)),     "bo": jax.random.normal(keys[7], (1, D)) * 0.02,
        "w1": glorot(keys[8], (D, D_FF)),  "b1": jax.random.normal(keys[9], (1, D_FF)) * 0.02,
        "w2": glorot(keys[10], (D_FF, D)), "b2": jax.random.normal(keys[11], (1, D)) * 0.02,
        "ln1_a": jnp.ones((1, D), jnp.float32), "ln1_b": jnp.zeros((1, D), jnp.float32),
        "ln2_a": jnp.ones((1, D), jnp.float32), "ln2_b": jnp.zeros((1, D), jnp.float32),
    }

    xkey, _ = jax.random.split(keys[11])
    x = jax.random.normal(xkey, (B, S, D), jnp.float32)
    # causal mask, broadcast over heads (float32: nonzero = keep, 0 = masked)
    mask = jnp.broadcast_to(jnp.tril(jnp.ones((S, S), jnp.float32)), (B, S, S))

    ref = encoder_block_ref(x, mask, params, n_heads=H)

    # f32 compute path: tight check against the pure-JAX reference.
    out_f32 = jax.block_until_ready(
        encoder_block(x, mask, params, n_heads=H, compute_dtype=jnp.float32))
    assert out_f32.shape == (B, S, D)
    assert bool(jnp.all(jnp.isfinite(out_f32)))
    assert jnp.allclose(out_f32, ref, rtol=3e-3, atol=3e-3), "f32 path mismatch vs reference"

    # bf16 MXU path (f32 accumulation): looser tolerance, same semantics.
    out_bf16 = jax.block_until_ready(
        encoder_block(x, mask, params, n_heads=H, compute_dtype=jnp.bfloat16))
    assert out_bf16.shape == (B, S, D)
    assert bool(jnp.all(jnp.isfinite(out_bf16)))
    assert jnp.allclose(out_bf16, ref, rtol=5e-2, atol=2.5e-1), "bf16 path mismatch vs reference"

    print("KERNEL_OK")
</pallas_src>

<mosaic_0001>
module attributes {stable_mosaic.version = 11 : i64} {
  func.func @_encoder_block_kernel(%arg0: i32, %arg1: memref<2x8x32xf32, #tpu.memory_space<vmem>>, %arg2: memref<2x8x8xf32, #tpu.memory_space<vmem>>, %arg3: memref<32x96xf32, #tpu.memory_space<vmem>>, %arg4: memref<1x96xf32, #tpu.memory_space<vmem>>, %arg5: memref<32x32xf32, #tpu.memory_space<vmem>>, %arg6: memref<1x32xf32, #tpu.memory_space<vmem>>, %arg7: memref<32x64xf32, #tpu.memory_space<vmem>>, %arg8: memref<1x64xf32, #tpu.memory_space<vmem>>, %arg9: memref<64x32xf32, #tpu.memory_space<vmem>>, %arg10: memref<1x32xf32, #tpu.memory_space<vmem>>, %arg11: memref<1x32xf32, #tpu.memory_space<vmem>>, %arg12: memref<1x32xf32, #tpu.memory_space<vmem>>, %arg13: memref<1x32xf32, #tpu.memory_space<vmem>>, %arg14: memref<1x32xf32, #tpu.memory_space<vmem>>, %arg15: memref<2x8x32xf32, #tpu.memory_space<vmem>>) attributes {dimension_semantics = [#tpu.dimension_semantics<parallel>], iteration_bounds = array<i64: 1>, scalar_prefetch = 0 : i64, scratch_operands = 0 : i64, tpu.core_type = #tpu.core_type<tc>, window_params = [{transform_indices = @transform_0, window_bounds = array<i64: 2, 8, 32>}, {transform_indices = @transform_1, window_bounds = array<i64: 2, 8, 8>}, {pipeline_mode = #tpu.pipeline_mode<synchronous>, transform_indices = @transform_2, window_bounds = array<i64: 32, 96>}, {pipeline_mode = #tpu.pipeline_mode<synchronous>, transform_indices = @transform_3, window_bounds = array<i64: 1, 96>}, {pipeline_mode = #tpu.pipeline_mode<synchronous>, transform_indices = @transform_4, window_bounds = array<i64: 32, 32>}, {pipeline_mode = #tpu.pipeline_mode<synchronous>, transform_indices = @transform_5, window_bounds = array<i64: 1, 32>}, {pipeline_mode = #tpu.pipeline_mode<synchronous>, transform_indices = @transform_6, window_bounds = array<i64: 32, 64>}, {pipeline_mode = #tpu.pipeline_mode<synchronous>, transform_indices = @transform_7, window_bounds = array<i64: 1, 64>}, {pipeline_mode = #tpu.pipeline_mode<synchronous>, transform_indices = @transform_8, window_bounds = array<i64: 64, 32>}, {pipeline_mode = #tpu.pipeline_mode<synchronous>, transform_indices = @transform_9, window_bounds = array<i64: 1, 32>}, {pipeline_mode = #tpu.pipeline_mode<synchronous>, transform_indices = @transform_10, window_bounds = array<i64: 1, 32>}, {pipeline_mode = #tpu.pipeline_mode<synchronous>, transform_indices = @transform_11, window_bounds = array<i64: 1, 32>}, {pipeline_mode = #tpu.pipeline_mode<synchronous>, transform_indices = @transform_12, window_bounds = array<i64: 1, 32>}, {pipeline_mode = #tpu.pipeline_mode<synchronous>, transform_indices = @transform_13, window_bounds = array<i64: 1, 32>}, {transform_indices = @transform_14, window_bounds = array<i64: 2, 8, 32>}]} {
    %c0 = arith.constant 0 : index
    %c0_0 = arith.constant 0 : index
    %c0_1 = arith.constant 0 : index
    %0 = vector.load %arg1[%c0, %c0_0, %c0_1] : memref<2x8x32xf32, #tpu.memory_space<vmem>>, vector<2x8x32xf32>
    %1 = vector.shape_cast %0 : vector<2x8x32xf32> to vector<16x32xf32>
    %c0_2 = arith.constant 0 : index
    %c0_3 = arith.constant 0 : index
    %c0_4 = arith.constant 0 : index
    %2 = vector.load %arg2[%c0_2, %c0_3, %c0_4] : memref<2x8x8xf32, #tpu.memory_space<vmem>>, vector<2x8x8xf32>
    %cst = arith.constant 0.000000e+00 : f32
    %3 = vector.broadcast %cst : f32 to vector<2x8x8xf32>
    %4 = arith.cmpf oeq, %2, %3 : vector<2x8x8xf32>
    %c0_5 = arith.constant 0 : index
    %c0_6 = arith.constant 0 : index
    %5 = vector.load %arg3[%c0_5, %c0_6] : memref<32x96xf32, #tpu.memory_space<vmem>>, vector<32x96xf32>
    %c0_7 = arith.constant 0 : index
    %c0_8 = arith.constant 0 : index
    %6 = vector.load %arg4[%c0_7, %c0_8] : memref<1x96xf32, #tpu.memory_space<vmem>>, vector<1x96xf32>
    %c0_9 = arith.constant 0 : index
    %c0_10 = arith.constant 0 : index
    %7 = vector.load %arg5[%c0_9, %c0_10] : memref<32x32xf32, #tpu.memory_space<vmem>>, vector<32x32xf32>
    %c0_11 = arith.constant 0 : index
    %c0_12 = arith.constant 0 : index
    %8 = vector.load %arg6[%c0_11, %c0_12] : memref<1x32xf32, #tpu.memory_space<vmem>>, vector<1x32xf32>
    %c0_13 = arith.constant 0 : index
    %c0_14 = arith.constant 0 : index
    %9 = vector.load %arg7[%c0_13, %c0_14] : memref<32x64xf32, #tpu.memory_space<vmem>>, vector<32x64xf32>
    %c0_15 = arith.constant 0 : index
    %c0_16 = arith.constant 0 : index
    %10 = vector.load %arg8[%c0_15, %c0_16] : memref<1x64xf32, #tpu.memory_space<vmem>>, vector<1x64xf32>
    %c0_17 = arith.constant 0 : index
    %c0_18 = arith.constant 0 : index
    %11 = vector.load %arg9[%c0_17, %c0_18] : memref<64x32xf32, #tpu.memory_space<vmem>>, vector<64x32xf32>
    %c0_19 = arith.constant 0 : index
    %c0_20 = arith.constant 0 : index
    %12 = vector.load %arg10[%c0_19, %c0_20] : memref<1x32xf32, #tpu.memory_space<vmem>>, vector<1x32xf32>
    %c0_21 = arith.constant 0 : index
    %c0_22 = arith.constant 0 : index
    %13 = vector.load %arg11[%c0_21, %c0_22] : memref<1x32xf32, #tpu.memory_space<vmem>>, vector<1x32xf32>
    %c0_23 = arith.constant 0 : index
    %c0_24 = arith.constant 0 : index
    %14 = vector.load %arg12[%c0_23, %c0_24] : memref<1x32xf32, #tpu.memory_space<vmem>>, vector<1x32xf32>
    %cst_25 = arith.constant dense<0.000000e+00> : vector<16xf32>
    %15 = vector.multi_reduction <add>, %1, %cst_25 [1] : vector<16x32xf32> to vector<16xf32>
    %16 = vector.shape_cast %15 : vector<16xf32> to vector<16x1xf32>
    %cst_26 = arith.constant 3.200000e+01 : f32
    %17 = vector.broadcast %cst_26 : f32 to vector<16x1xf32>
    %18 = arith.divf %16, %17 : vector<16x1xf32>
    %19 = vector.broadcast %18 : vector<16x1xf32> to vector<16x32xf32>
    %20 = arith.subf %1, %19 : vector<16x32xf32>
    %21 = arith.mulf %20, %20 : vector<16x32xf32>
    %cst_27 = arith.constant dense<0.000000e+00> : vector<16xf32>
    %22 = vector.multi_reduction <add>, %21, %cst_27 [1] : vector<16x32xf32> to vector<16xf32>
    %23 = vector.shape_cast %22 : vector<16xf32> to vector<16x1xf32>
    %cst_28 = arith.constant 0.0322580636 : f32
    %24 = vector.broadcast %cst_28 : f32 to vector<16x1xf32>
    %25 = arith.mulf %23, %24 : vector<16x1xf32>
    %26 = math.sqrt %25 : vector<16x1xf32>
    %27 = vector.broadcast %18 : vector<16x1xf32> to vector<16x32xf32>
    %28 = arith.subf %1, %27 : vector<16x32xf32>
    %29 = vector.broadcast %13 : vector<1x32xf32> to vector<16x32xf32>
    %30 = arith.mulf %29, %28 : vector<16x32xf32>
    %cst_29 = arith.constant 9.99999997E-7 : f32
    %31 = vector.broadcast %cst_29 : f32 to vector<16x1xf32>
    %32 = arith.addf %26, %31 : vector<16x1xf32>
    %33 = vector.broadcast %32 : vector<16x1xf32> to vector<16x32xf32>
    %34 = arith.divf %30, %33 : vector<16x32xf32>
    %35 = vector.broadcast %14 : vector<1x32xf32> to vector<16x32xf32>
    %36 = arith.addf %34, %35 : vector<16x32xf32>
    %cst_30 = arith.constant dense<0.000000e+00> : vector<16x96xf32>
    %37 = tpu.matmul %36, %5, %cst_30 {dimension_numbers = #tpu.dot_dimension_numbers<[1], [0], [0], [1], [0, 0, 1, 1], [], []>} : vector<16x32xf32>, vector<32x96xf32>, vector<16x96xf32> -> vector<16x96xf32>
    %38 = vector.broadcast %6 : vector<1x96xf32> to vector<16x96xf32>
    %39 = arith.addf %37, %38 : vector<16x96xf32>
    %cst_31 = arith.constant 0.000000e+00 : f32
    %40 = vector.broadcast %cst_31 : f32 to vector<16x32xf32>
    %41 = vector.extract_strided_slice %39 {offsets = [0, 0], sizes = [16, 8], strides = [1, 1]} : vector<16x96xf32> to vector<16x8xf32>
    %42 = vector.shape_cast %41 : vector<16x8xf32> to vector<2x8x8xf32>
    %43 = vector.extract_strided_slice %39 {offsets = [0, 32], sizes = [16, 8], strides = [1, 1]} : vector<16x96xf32> to vector<16x8xf32>
    %44 = vector.shape_cast %43 : vector<16x8xf32> to vector<2x8x8xf32>
    %45 = vector.extract_strided_slice %39 {offsets = [0, 64], sizes = [16, 8], strides = [1, 1]} : vector<16x96xf32> to vector<16x8xf32>
    %46 = vector.shape_cast %45 : vector<16x8xf32> to vector<2x8x8xf32>
    "tpu.trace_start"() <{level = 10 : i32, message = "bqd,bkd->bqk"}> : () -> ()
    %cst_32 = arith.constant dense<0.000000e+00> : vector<2x8x8xf32>
    %47 = tpu.matmul %42, %44, %cst_32 {dimension_numbers = #tpu.dot_dimension_numbers<[2], [2], [1], [1], [0, 0, 0, 1, 1, 1], [0], [0]>} : vector<2x8x8xf32>, vector<2x8x8xf32>, vector<2x8x8xf32> -> vector<2x8x8xf32>
    "tpu.trace_stop"() : () -> ()
    %cst_33 = arith.constant 0.353553385 : f32
    %48 = vector.broadcast %cst_33 : f32 to vector<2x8x8xf32>
    %49 = arith.mulf %47, %48 : vector<2x8x8xf32>
    %cst_34 = arith.constant -9.99999971E-10 : f32
    %50 = vector.broadcast %cst_34 : f32 to vector<2x8x8xf32>
    %51 = arith.select %4, %50, %49 : vector<2x8x8xi1>, vector<2x8x8xf32>
    %cst_35 = arith.constant dense<0xFF800000> : vector<2x8xf32>
    %52 = vector.multi_reduction <maximumf>, %51, %cst_35 [2] : vector<2x8x8xf32> to vector<2x8xf32>
    %53 = vector.shape_cast %52 : vector<2x8xf32> to vector<2x8x1xf32>
    %54 = vector.broadcast %53 : vector<2x8x1xf32> to vector<2x8x8xf32>
    %55 = arith.subf %51, %54 : vector<2x8x8xf32>
    %56 = math.exp %55 : vector<2x8x8xf32>
    %cst_36 = arith.constant dense<0.000000e+00> : vector<2x8xf32>
    %57 = vector.multi_reduction <add>, %56, %cst_36 [2] : vector<2x8x8xf32> to vector<2x8xf32>
    %58 = vector.shape_cast %57 : vector<2x8xf32> to vector<2x8x1xf32>
    %cst_37 = arith.constant 1.000000e+00 : f32
    %59 = vector.broadcast %cst_37 : f32 to vector<2x8x1xf32>
    %60 = arith.divf %59, %58 : vector<2x8x1xf32>
    %61 = vector.broadcast %60 : vector<2x8x1xf32> to vector<2x8x8xf32>
    %62 = arith.mulf %56, %61 : vector<2x8x8xf32>
    "tpu.trace_start"() <{level = 10 : i32, message = "bqk,bkd->bqd"}> : () -> ()
    %cst_38 = arith.constant dense<0.000000e+00> : vector<2x8x8xf32>
    %63 = tpu.matmul %62, %46, %cst_38 {dimension_numbers = #tpu.dot_dimension_numbers<[2], [1], [1], [2], [0, 0, 0, 1, 1, 2], [0], [0]>} : vector<2x8x8xf32>, vector<2x8x8xf32>, vector<2x8x8xf32> -> vector<2x8x8xf32>
    "tpu.trace_stop"() : () -> ()
    %64 = vector.shape_cast %63 : vector<2x8x8xf32> to vector<16x8xf32>
    %65 = vector.extract_strided_slice %7 {offsets = [0, 0], sizes = [8, 32], strides = [1, 1]} : vector<32x32xf32> to vector<8x32xf32>
    %cst_39 = arith.constant dense<0.000000e+00> : vector<16x32xf32>
    %66 = tpu.matmul %64, %65, %cst_39 {dimension_numbers = #tpu.dot_dimension_numbers<[1], [0], [0], [1], [0, 0, 1, 1], [], []>} : vector<16x8xf32>, vector<8x32xf32>, vector<16x32xf32> -> vector<16x32xf32>
    %67 = arith.addf %40, %66 : vector<16x32xf32>
    %68 = vector.extract_strided_slice %39 {offsets = [0, 8], sizes = [16, 8], strides = [1, 1]} : vector<16x96xf32> to vector<16x8xf32>
    %69 = vector.shape_cast %68 : vector<16x8xf32> to vector<2x8x8xf32>
    %70 = vector.extract_strided_slice %39 {offsets = [0, 40], sizes = [16, 8], strides = [1, 1]} : vector<16x96xf32> to vector<16x8xf32>
    %71 = vector.shape_cast %70 : vector<16x8xf32> to vector<2x8x8xf32>
    %72 = vector.extract_strided_slice %39 {offsets = [0, 72], sizes = [16, 8], strides = [1, 1]} : vector<16x96xf32> to vector<16x8xf32>
    %73 = vector.shape_cast %72 : vector<16x8xf32> to vector<2x8x8xf32>
    "tpu.trace_start"() <{level = 10 : i32, message = "bqd,bkd->bqk"}> : () -> ()
    %cst_40 = arith.constant dense<0.000000e+00> : vector<2x8x8xf32>
    %74 = tpu.matmul %69, %71, %cst_40 {dimension_numbers = #tpu.dot_dimension_numbers<[2], [2], [1], [1], [0, 0, 0, 1, 1, 1], [0], [0]>} : vector<2x8x8xf32>, vector<2x8x8xf32>, vector<2x8x8xf32> -> vector<2x8x8xf32>
    "tpu.trace_stop"() : () -> ()
    %cst_41 = arith.constant 0.353553385 : f32
    %75 = vector.broadcast %cst_41 : f32 to vector<2x8x8xf32>
    %76 = arith.mulf %74, %75 : vector<2x8x8xf32>
    %cst_42 = arith.constant -9.99999971E-10 : f32
    %77 = vector.broadcast %cst_42 : f32 to vector<2x8x8xf32>
    %78 = arith.select %4, %77, %76 : vector<2x8x8xi1>, vector<2x8x8xf32>
    %cst_43 = arith.constant dense<0xFF800000> : vector<2x8xf32>
    %79 = vector.multi_reduction <maximumf>, %78, %cst_43 [2] : vector<2x8x8xf32> to vector<2x8xf32>
    %80 = vector.shape_cast %79 : vector<2x8xf32> to vector<2x8x1xf32>
    %81 = vector.broadcast %80 : vector<2x8x1xf32> to vector<2x8x8xf32>
    %82 = arith.subf %78, %81 : vector<2x8x8xf32>
    %83 = math.exp %82 : vector<2x8x8xf32>
    %cst_44 = arith.constant dense<0.000000e+00> : vector<2x8xf32>
    %84 = vector.multi_reduction <add>, %83, %cst_44 [2] : vector<2x8x8xf32> to vector<2x8xf32>
    %85 = vector.shape_cast %84 : vector<2x8xf32> to vector<2x8x1xf32>
    %cst_45 = arith.constant 1.000000e+00 : f32
    %86 = vector.broadcast %cst_45 : f32 to vector<2x8x1xf32>
    %87 = arith.divf %86, %85 : vector<2x8x1xf32>
    %88 = vector.broadcast %87 : vector<2x8x1xf32> to vector<2x8x8xf32>
    %89 = arith.mulf %83, %88 : vector<2x8x8xf32>
    "tpu.trace_start"() <{level = 10 : i32, message = "bqk,bkd->bqd"}> : () -> ()
    %cst_46 = arith.constant dense<0.000000e+00> : vector<2x8x8xf32>
    %90 = tpu.matmul %89, %73, %cst_46 {dimension_numbers = #tpu.dot_dimension_numbers<[2], [1], [1], [2], [0, 0, 0, 1, 1, 2], [0], [0]>} : vector<2x8x8xf32>, vector<2x8x8xf32>, vector<2x8x8xf32> -> vector<2x8x8xf32>
    "tpu.trace_stop"() : () -> ()
    %91 = vector.shape_cast %90 : vector<2x8x8xf32> to vector<16x8xf32>
    %92 = vector.extract_strided_slice %7 {offsets = [8, 0], sizes = [8, 32], strides = [1, 1]} : vector<32x32xf32> to vector<8x32xf32>
    %cst_47 = arith.constant dense<0.000000e+00> : vector<16x32xf32>
    %93 = tpu.matmul %91, %92, %cst_47 {dimension_numbers = #tpu.dot_dimension_numbers<[1], [0], [0], [1], [0, 0, 1, 1], [], []>} : vector<16x8xf32>, vector<8x32xf32>, vector<16x32xf32> -> vector<16x32xf32>
    %94 = arith.addf %67, %93 : vector<16x32xf32>
    %95 = vector.extract_strided_slice %39 {offsets = [0, 16], sizes = [16, 8], strides = [1, 1]} : vector<16x96xf32> to vector<16x8xf32>
    %96 = vector.shape_cast %95 : vector<16x8xf32> to vector<2x8x8xf32>
    %97 = vector.extract_strided_slice %39 {offsets = [0, 48], sizes = [16, 8], strides = [1, 1]} : vector<16x96xf32> to vector<16x8xf32>
    %98 = vector.shape_cast %97 : vector<16x8xf32> to vector<2x8x8xf32>
    %99 = vector.extract_strided_slice %39 {offsets = [0, 80], sizes = [16, 8], strides = [1, 1]} : vector<16x96xf32> to vector<16x8xf32>
    %100 = vector.shape_cast %99 : vector<16x8xf32> to vector<2x8x8xf32>
    "tpu.trace_start"() <{level = 10 : i32, message = "bqd,bkd->bqk"}> : () -> ()
    %cst_48 = arith.constant dense<0.000000e+00> : vector<2x8x8xf32>
    %101 = tpu.matmul %96, %98, %cst_48 {dimension_numbers = #tpu.dot_dimension_numbers<[2], [2], [1], [1], [0, 0, 0, 1, 1, 1], [0], [0]>} : vector<2x8x8xf32>, vector<2x8x8xf32>, vector<2x8x8xf32> -> vector<2x8x8xf32>
    "tpu.trace_stop"() : () -> ()
    %cst_49 = arith.constant 0.353553385 : f32
    %102 = vector.broadcast %cst_49 : f32 to vector<2x8x8xf32>
    %103 = arith.mulf %101, %102 : vector<2x8x8xf32>
    %cst_50 = arith.constant -9.99999971E-10 : f32
    %104 = vector.broadcast %cst_50 : f32 to vector<2x8x8xf32>
    %105 = arith.select %4, %104, %103 : vector<2x8x8xi1>, vector<2x8x8xf32>
    %cst_51 = arith.constant dense<0xFF800000> : vector<2x8xf32>
    %106 = vector.multi_reduction <maximumf>, %105, %cst_51 [2] : vector<2x8x8xf32> to vector<2x8xf32>
    %107 = vector.shape_cast %106 : vector<2x8xf32> to vector<2x8x1xf32>
    %108 = vector.broadcast %107 : vector<2x8x1xf32> to vector<2x8x8xf32>
    %109 = arith.subf %105, %108 : vector<2x8x8xf32>
    %110 = math.exp %109 : vector<2x8x8xf32>
    %cst_52 = arith.constant dense<0.000000e+00> : vector<2x8xf32>
    %111 = vector.multi_reduction <add>, %110, %cst_52 [2] : vector<2x8x8xf32> to vector<2x8xf32>
    %112 = vector.shape_cast %111 : vector<2x8xf32> to vector<2x8x1xf32>
    %cst_53 = arith.constant 1.000000e+00 : f32
    %113 = vector.broadcast %cst_53 : f32 to vector<2x8x1xf32>
    %114 = arith.divf %113, %112 : vector<2x8x1xf32>
    %115 = vector.broadcast %114 : vector<2x8x1xf32> to vector<2x8x8xf32>
    %116 = arith.mulf %110, %115 : vector<2x8x8xf32>
    "tpu.trace_start"() <{level = 10 : i32, message = "bqk,bkd->bqd"}> : () -> ()
    %cst_54 = arith.constant dense<0.000000e+00> : vector<2x8x8xf32>
    %117 = tpu.matmul %116, %100, %cst_54 {dimension_numbers = #tpu.dot_dimension_numbers<[2], [1], [1], [2], [0, 0, 0, 1, 1, 2], [0], [0]>} : vector<2x8x8xf32>, vector<2x8x8xf32>, vector<2x8x8xf32> -> vector<2x8x8xf32>
    "tpu.trace_stop"() : () -> ()
    %118 = vector.shape_cast %117 : vector<2x8x8xf32> to vector<16x8xf32>
    %119 = vector.extract_strided_slice %7 {offsets = [16, 0], sizes = [8, 32], strides = [1, 1]} : vector<32x32xf32> to vector<8x32xf32>
    %cst_55 = arith.constant dense<0.000000e+00> : vector<16x32xf32>
    %120 = tpu.matmul %118, %119, %cst_55 {dimension_numbers = #tpu.dot_dimension_numbers<[1], [0], [0], [1], [0, 0, 1, 1], [], []>} : vector<16x8xf32>, vector<8x32xf32>, vector<16x32xf32> -> vector<16x32xf32>
    %121 = arith.addf %94, %120 : vector<16x32xf32>
    %122 = vector.extract_strided_slice %39 {offsets = [0, 24], sizes = [16, 8], strides = [1, 1]} : vector<16x96xf32> to vector<16x8xf32>
    %123 = vector.shape_cast %122 : vector<16x8xf32> to vector<2x8x8xf32>
    %124 = vector.extract_strided_slice %39 {offsets = [0, 56], sizes = [16, 8], strides = [1, 1]} : vector<16x96xf32> to vector<16x8xf32>
    %125 = vector.shape_cast %124 : vector<16x8xf32> to vector<2x8x8xf32>
    %126 = vector.extract_strided_slice %39 {offsets = [0, 88], sizes = [16, 8], strides = [1, 1]} : vector<16x96xf32> to vector<16x8xf32>
    %127 = vector.shape_cast %126 : vector<16x8xf32> to vector<2x8x8xf32>
    "tpu.trace_start"() <{level = 10 : i32, message = "bqd,bkd->bqk"}> : () -> ()
    %cst_56 = arith.constant dense<0.000000e+00> : vector<2x8x8xf32>
    %128 = tpu.matmul %123, %125, %cst_56 {dimension_numbers = #tpu.dot_dimension_numbers<[2], [2], [1], [1], [0, 0, 0, 1, 1, 1], [0], [0]>} : vector<2x8x8xf32>, vector<2x8x8xf32>, vector<2x8x8xf32> -> vector<2x8x8xf32>
    "tpu.trace_stop"() : () -> ()
    %cst_57 = arith.constant 0.353553385 : f32
    %129 = vector.broadcast %cst_57 : f32 to vector<2x8x8xf32>
    %130 = arith.mulf %128, %129 : vector<2x8x8xf32>
    %cst_58 = arith.constant -9.99999971E-10 : f32
    %131 = vector.broadcast %cst_58 : f32 to vector<2x8x8xf32>
    %132 = arith.select %4, %131, %130 : vector<2x8x8xi1>, vector<2x8x8xf32>
    %cst_59 = arith.constant dense<0xFF800000> : vector<2x8xf32>
    %133 = vector.multi_reduction <maximumf>, %132, %cst_59 [2] : vector<2x8x8xf32> to vector<2x8xf32>
    %134 = vector.shape_cast %133 : vector<2x8xf32> to vector<2x8x1xf32>
    %135 = vector.broadcast %134 : vector<2x8x1xf32> to vector<2x8x8xf32>
    %136 = arith.subf %132, %135 : vector<2x8x8xf32>
    %137 = math.exp %136 : vector<2x8x8xf32>
    %cst_60 = arith.constant dense<0.000000e+00> : vector<2x8xf32>
    %138 = vector.multi_reduction <add>, %137, %cst_60 [2] : vector<2x8x8xf32> to vector<2x8xf32>
    %139 = vector.shape_cast %138 : vector<2x8xf32> to vector<2x8x1xf32>
    %cst_61 = arith.constant 1.000000e+00 : f32
    %140 = vector.broadcast %cst_61 : f32 to vector<2x8x1xf32>
    %141 = arith.divf %140, %139 : vector<2x8x1xf32>
    %142 = vector.broadcast %141 : vector<2x8x1xf32> to vector<2x8x8xf32>
    %143 = arith.mulf %137, %142 : vector<2x8x8xf32>
    "tpu.trace_start"() <{level = 10 : i32, message = "bqk,bkd->bqd"}> : () -> ()
    %cst_62 = arith.constant dense<0.000000e+00> : vector<2x8x8xf32>
    %144 = tpu.matmul %143, %127, %cst_62 {dimension_numbers = #tpu.dot_dimension_numbers<[2], [1], [1], [2], [0, 0, 0, 1, 1, 2], [0], [0]>} : vector<2x8x8xf32>, vector<2x8x8xf32>, vector<2x8x8xf32> -> vector<2x8x8xf32>
    "tpu.trace_stop"() : () -> ()
    %145 = vector.shape_cast %144 : vector<2x8x8xf32> to vector<16x8xf32>
    %146 = vector.extract_strided_slice %7 {offsets = [24, 0], sizes = [8, 32], strides = [1, 1]} : vector<32x32xf32> to vector<8x32xf32>
    %cst_63 = arith.constant dense<0.000000e+00> : vector<16x32xf32>
    %147 = tpu.matmul %145, %146, %cst_63 {dimension_numbers = #tpu.dot_dimension_numbers<[1], [0], [0], [1], [0, 0, 1, 1], [], []>} : vector<16x8xf32>, vector<8x32xf32>, vector<16x32xf32> -> vector<16x32xf32>
    %148 = arith.addf %121, %147 : vector<16x32xf32>
    %149 = vector.broadcast %8 : vector<1x32xf32> to vector<16x32xf32>
    %150 = arith.addf %148, %149 : vector<16x32xf32>
    %151 = arith.addf %1, %150 : vector<16x32xf32>
    %c0_64 = arith.constant 0 : index
    %c0_65 = arith.constant 0 : index
    %152 = vector.load %arg13[%c0_64, %c0_65] : memref<1x32xf32, #tpu.memory_space<vmem>>, vector<1x32xf32>
    %c0_66 = arith.constant 0 : index
    %c0_67 = arith.constant 0 : index
    %153 = vector.load %arg14[%c0_66, %c0_67] : memref<1x32xf32, #tpu.memory_space<vmem>>, vector<1x32xf32>
    %cst_68 = arith.constant dense<0.000000e+00> : vector<16xf32>
    %154 = vector.multi_reduction <add>, %151, %cst_68 [1] : vector<16x32xf32> to vector<16xf32>
    %155 = vector.shape_cast %154 : vector<16xf32> to vector<16x1xf32>
    %cst_69 = arith.constant 3.200000e+01 : f32
    %156 = vector.broadcast %cst_69 : f32 to vector<16x1xf32>
    %157 = arith.divf %155, %156 : vector<16x1xf32>
    %158 = vector.broadcast %157 : vector<16x1xf32> to vector<16x32xf32>
    %159 = arith.subf %151, %158 : vector<16x32xf32>
    %160 = arith.mulf %159, %159 : vector<16x32xf32>
    %cst_70 = arith.constant dense<0.000000e+00> : vector<16xf32>
    %161 = vector.multi_reduction <add>, %160, %cst_70 [1] : vector<16x32xf32> to vector<16xf32>
    %162 = vector.shape_cast %161 : vector<16xf32> to vector<16x1xf32>
    %cst_71 = arith.constant 0.0322580636 : f32
    %163 = vector.broadcast %cst_71 : f32 to vector<16x1xf32>
    %164 = arith.mulf %162, %163 : vector<16x1xf32>
    %165 = math.sqrt %164 : vector<16x1xf32>
    %166 = vector.broadcast %157 : vector<16x1xf32> to vector<16x32xf32>
    %167 = arith.subf %151, %166 : vector<16x32xf32>
    %168 = vector.broadcast %152 : vector<1x32xf32> to vector<16x32xf32>
    %169 = arith.mulf %168, %167 : vector<16x32xf32>
    %cst_72 = arith.constant 9.99999997E-7 : f32
    %170 = vector.broadcast %cst_72 : f32 to vector<16x1xf32>
    %171 = arith.addf %165, %170 : vector<16x1xf32>
    %172 = vector.broadcast %171 : vector<16x1xf32> to vector<16x32xf32>
    %173 = arith.divf %169, %172 : vector<16x32xf32>
    %174 = vector.broadcast %153 : vector<1x32xf32> to vector<16x32xf32>
    %175 = arith.addf %173, %174 : vector<16x32xf32>
    %cst_73 = arith.constant dense<0.000000e+00> : vector<16x64xf32>
    %176 = tpu.matmul %175, %9, %cst_73 {dimension_numbers = #tpu.dot_dimension_numbers<[1], [0], [0], [1], [0, 0, 1, 1], [], []>} : vector<16x32xf32>, vector<32x64xf32>, vector<16x64xf32> -> vector<16x64xf32>
    %177 = vector.broadcast %10 : vector<1x64xf32> to vector<16x64xf32>
    %178 = arith.addf %176, %177 : vector<16x64xf32>
    %cst_74 = arith.constant 0.000000e+00 : f32
    %179 = vector.broadcast %cst_74 : f32 to vector<16x64xf32>
    %180 = arith.maximumf %178, %179 : vector<16x64xf32>
    %cst_75 = arith.constant dense<0.000000e+00> : vector<16x32xf32>
    %181 = tpu.matmul %180, %11, %cst_75 {dimension_numbers = #tpu.dot_dimension_numbers<[1], [0], [0], [1], [0, 0, 1, 1], [], []>} : vector<16x64xf32>, vector<64x32xf32>, vector<16x32xf32> -> vector<16x32xf32>
    %182 = vector.broadcast %12 : vector<1x32xf32> to vector<16x32xf32>
    %183 = arith.addf %181, %182 : vector<16x32xf32>
    %184 = arith.addf %151, %183 : vector<16x32xf32>
    %185 = vector.shape_cast %184 : vector<16x32xf32> to vector<2x8x32xf32>
    %c0_76 = arith.constant 0 : index
    %c0_77 = arith.constant 0 : index
    %c0_78 = arith.constant 0 : index
    %186 = vector.load %arg15[%c0_76, %c0_77, %c0_78] : memref<2x8x32xf32, #tpu.memory_space<vmem>>, vector<2x8x32xf32>
    tpu.vector_store %arg15[%c0_76, %c0_77, %c0_78], %185 {strides = array<i32>} : memref<2x8x32xf32, #tpu.memory_space<vmem>>, vector<2x8x32xf32>,
    return
  }
  func.func @transform_0(%arg0: i32) -> (i32, i32, i32) {
    %c0_i32 = arith.constant 0 : i32
    %c0_i32_0 = arith.constant 0 : i32
    %c0_i32_1 = arith.constant 0 : i32
    return %arg0, %c0_i32, %c0_i32_0 : i32, i32, i32
  }
  func.func @transform_1(%arg0: i32) -> (i32, i32, i32) {
    %c0_i32 = arith.constant 0 : i32
    %c0_i32_0 = arith.constant 0 : i32
    %c0_i32_1 = arith.constant 0 : i32
    return %arg0, %c0_i32, %c0_i32_0 : i32, i32, i32
  }
  func.func @transform_2(%arg0: i32) -> (i32, i32) {
    %c0_i32 = arith.constant 0 : i32
    %c0_i32_0 = arith.constant 0 : i32
    %c0_i32_1 = arith.constant 0 : i32
    return %c0_i32, %c0_i32_0 : i32, i32
  }
  func.func @transform_3(%arg0: i32) -> (i32, i32) {
    %c0_i32 = arith.constant 0 : i32
    %c0_i32_0 = arith.constant 0 : i32
    %c0_i32_1 = arith.constant 0 : i32
    return %c0_i32, %c0_i32_0 : i32, i32
  }
  func.func @transform_4(%arg0: i32) -> (i32, i32) {
    %c0_i32 = arith.constant 0 : i32
    %c0_i32_0 = arith.constant 0 : i32
    %c0_i32_1 = arith.constant 0 : i32
    return %c0_i32, %c0_i32_0 : i32, i32
  }
  func.func @transform_5(%arg0: i32) -> (i32, i32) {
    %c0_i32 = arith.constant 0 : i32
    %c0_i32_0 = arith.constant 0 : i32
    %c0_i32_1 = arith.constant 0 : i32
    return %c0_i32, %c0_i32_0 : i32, i32
  }
  func.func @transform_6(%arg0: i32) -> (i32, i32) {
    %c0_i32 = arith.constant 0 : i32
    %c0_i32_0 = arith.constant 0 : i32
    %c0_i32_1 = arith.constant 0 : i32
    return %c0_i32, %c0_i32_0 : i32, i32
  }
  func.func @transform_7(%arg0: i32) -> (i32, i32) {
    %c0_i32 = arith.constant 0 : i32
    %c0_i32_0 = arith.constant 0 : i32
    %c0_i32_1 = arith.constant 0 : i32
    return %c0_i32, %c0_i32_0 : i32, i32
  }
  func.func @transform_8(%arg0: i32) -> (i32, i32) {
    %c0_i32 = arith.constant 0 : i32
    %c0_i32_0 = arith.constant 0 : i32
    %c0_i32_1 = arith.constant 0 : i32
    return %c0_i32, %c0_i32_0 : i32, i32
  }
  func.func @transform_9(%arg0: i32) -> (i32, i32) {
    %c0_i32 = arith.constant 0 : i32
    %c0_i32_0 = arith.constant 0 : i32
    %c0_i32_1 = arith.constant 0 : i32
    return %c0_i32, %c0_i32_0 : i32, i32
  }
  func.func @transform_10(%arg0: i32) -> (i32, i32) {
    %c0_i32 = arith.constant 0 : i32
    %c0_i32_0 = arith.constant 0 : i32
    %c0_i32_1 = arith.constant 0 : i32
    return %c0_i32, %c0_i32_0 : i32, i32
  }
  func.func @transform_11(%arg0: i32) -> (i32, i32) {
    %c0_i32 = arith.constant 0 : i32
    %c0_i32_0 = arith.constant 0 : i32
    %c0_i32_1 = arith.constant 0 : i32
    return %c0_i32, %c0_i32_0 : i32, i32
  }
  func.func @transform_12(%arg0: i32) -> (i32, i32) {
    %c0_i32 = arith.constant 0 : i32
    %c0_i32_0 = arith.constant 0 : i32
    %c0_i32_1 = arith.constant 0 : i32
    return %c0_i32, %c0_i32_0 : i32, i32
  }
  func.func @transform_13(%arg0: i32) -> (i32, i32) {
    %c0_i32 = arith.constant 0 : i32
    %c0_i32_0 = arith.constant 0 : i32
    %c0_i32_1 = arith.constant 0 : i32
    return %c0_i32, %c0_i32_0 : i32, i32
  }
  func.func @transform_14(%arg0: i32) -> (i32, i32, i32) {
    %c0_i32 = arith.constant 0 : i32
    %c0_i32_0 = arith.constant 0 : i32
    %c0_i32_1 = arith.constant 0 : i32
    return %arg0, %c0_i32, %c0_i32_0 : i32, i32, i32
  }
}

</mosaic_0001>

<bundles_post_ra>
// kernel: tpu_custom_call.1
= control target key start
LH: loop header
LB: loop body
LE: loop exit
PB: predicated region body
PF: predicated region fallthrough
CT: control target
= control target key end

     0   :  { %19 = vsyncpa [#allocation3], 0  ;;  %s3036_s0 = inlined_call_operand.hbm [shape: f32[2,8,32], index: 0, kind: input, shape index: {}]   ;;  %s3037_s1 = inlined_call_operand.hbm [shape: f32[2,8,8], index: 1, kind: input, shape index: {}]   ;;  %s3038_s2 = inlined_call_operand.vmem [shape: f32[32,96], index: 2, kind: input, shape index: {}]   ;;  %s3039_s3 = inlined_call_operand.vmem [shape: f32[1,96], index: 3, kind: input, shape index: {}]   ;;  %s3040_s4 = inlined_call_operand.vmem [shape: f32[32,32], index: 4, kind: input, shape index: {}]   ;;  %s3041_s5 = inlined_call_operand.vmem [shape: f32[1,32], index: 5, kind: input, shape index: {}]   ;;  %s3042_s6 = inlined_call_operand.vmem [shape: f32[32,64], index: 6, kind: input, shape index: {}]   ;;  %s3043_s7 = inlined_call_operand.vmem [shape: f32[1,64], index: 7, kind: input, shape index: {}]   ;;  %s3044_s8 = inlined_call_operand.vmem [shape: f32[64,32], index: 8, kind: input, shape index: {}]   ;;  %s3045_s9 = inlined_call_operand.vmem [shape: f32[1,32], index: 9, kind: input, shape index: {}]   ;;  %s3046_s10 = inlined_call_operand.vmem [shape: f32[1,32], index: 10, kind: input, shape index: {}]   ;;  %s3047_s11 = inlined_call_operand.vmem [shape: f32[1,32], index: 11, kind: input, shape index: {}]   ;;  %s3048_s12 = inlined_call_operand.vmem [shape: f32[1,32], index: 12, kind: input, shape index: {}]   ;;  %s3049_s13 = inlined_call_operand.vmem [shape: f32[1,32], index: 13, kind: input, shape index: {}]   ;;  %s3050_s14 = inlined_call_operand.hbm [shape: f32[2,8,32], index: 14, kind: output, shape index: {}]  }
   0x1   :  { %20 = vsyncpa [#allocation6], 0 }
   0x2   :  { %21 = vsyncpa [#allocation4], 0  ;;  %s2620_s29 = smov [#allocation2]   ;;  %s2548_s17 = scalar_lea.hbm %s3036_s0, 256 }
   0x3   :  { %s27_s30 = sshll.u32 %s2620_s29, 4  ;;  %p2549_p0 = scmp.ne.s32.totalorder %s3036_s0, %s2548_s17  ;;  %s28_s30 = int_to_ptr.vmem [resolvable:$true] %s27_s30 }
   0x4   :  { %p2552_p1 = scmp.lt.u32.totalorder %s2548_s17, %s3036_s0 }
   0x6   :  { %p2554_p2 = pnand %p2552_p1, %p2549_p0 }
   0x8   :  { %2557 = shalt.err (!%p2554_p2)
}
   0x9   :  { %s2558_s22 = scalar_lea.vmem %s28_s30, 256  ;;  %p2563_p4 = scmp.lt.s32.totalorder %s28_s30, %s28_s30 }
   0xa   :  { %p2559_p3 = scmp.ne.s32.totalorder %s28_s30, %s2558_s22  ;;  %p2564_p5 = scmp.lt.s32.totalorder %s2558_s22, %s2558_s22 }
   0xc   :  { %p2565_p6 = por %p2564_p5, %p2563_p4 }
   0xe   :  { %p2566_p7 = pnand %p2565_p6, %p2559_p3 }
  0x10   :  { %2569 = shalt.err (!%p2566_p7)
}
  0x11   :  { %s2621_s23 = smov 128   ;;  %s2622_s24 = smov 8  }
  0x12   :  { %33 = dma.hbm_to_vmem [thread:$0]  %s3036_s0, 256, %s28_s30, [#allocation3], %s2621_s23, %s2621_s23, %s2622_s24  }
  0x13   :  { %s2623_s27 = smov [#allocation5]   ;;  %s2570_s16 = scalar_lea.hbm %s3037_s1, 256 }
  0x14   :  { %s39_s28 = sshll.u32 %s2623_s27, 4  ;;  %p2571_p8 = scmp.ne.s32.totalorder %s3037_s1, %s2570_s16  ;;  %s40_s28 = int_to_ptr.vmem [resolvable:$true] %s39_s28 }
  0x15   :  { %p2574_p9 = scmp.lt.u32.totalorder %s2570_s16, %s3037_s1 }
  0x17   :  { %p2576_p10 = pnand %p2574_p9, %p2571_p8 }
  0x19   :  { %2579 = shalt.err (!%p2576_p10)
}
  0x1a   :  { %s2580_s21 = scalar_lea.vmem %s40_s28, 256  ;;  %p2585_p12 = scmp.lt.s32.totalorder %s40_s28, %s40_s28 }
  0x1b   :  { %p2581_p11 = scmp.ne.s32.totalorder %s40_s28, %s2580_s21  ;;  %p2586_p13 = scmp.lt.s32.totalorder %s2580_s21, %s2580_s21 }
  0x1d   :  { %p2587_p0 = por %p2586_p13, %p2585_p12 }
  0x1f   :  { %p2588_p1 = pnand %p2587_p0, %p2581_p11 }
  0x21   :  { %2591 = shalt.err (!%p2588_p1)
}
  0x22   :  { %45 = dma.hbm_to_vmem [thread:$0]  %s3037_s1, 256, %s40_s28, [#allocation6], %s2621_s23, %s2621_s23, %s2622_s24  }
  0x23   :  { %2614 = dma.done.wait [#allocation3], 256  }
  0x24   :  { %2615 = vsyncadd [#allocation3], 4294967040 }
  0x25   :  { %2616 = dma.done.wait [#allocation6], 256  }
  0x26   :  { %2617 = vsyncadd [#allocation6], 4294967040  ;;  %vm108_vm0 = vcmask 261120   ;;  %v2743_v0 = vld [vmem:[#allocation2] sm:$0xff]  ;;  %v2745_v1 = vld [vmem:[#allocation2 + $0x8] sm:$0xff]  ;;  %v2624_v46 = vmov 0.0  }
  0x27   :  { %v109_v2 = vsel %vm108_vm0, %v2743_v0, 0.0  ;;  %v112_v3 = vsel %vm108_vm0, %v2745_v1, 0.0  ;;  %v82_v14 = vld [vmem:[%s3038_s2] sm:$0xff]  ;;  %v83_v15 = vld [vmem:[%s3038_s2 + $0x8] sm:$0xff]  ;;  %v84_v16 = vld [vmem:[%s3038_s2 + $0x10] sm:$0xff]  ;;  %2324 = vmatprep.subr.mxu0 %v2624_v46  ;;  %vm2625_vm5 = vmmov 0  }
  0x28   :  { %110 = vadd.xlane.f32.xlu0 %v109_v2  ;;  %v2444_v17 = vpack.c.bf16 %v83_v15, %v82_v14  ;;  %v85_v18 = vld [vmem:[%s3038_s2 + $0x18] sm:$0xff]  ;;  %v2191_v36 = vld [vmem:[%s3046_s10] ss:$0 sm:$0xff]  ;;  %2326 = vmatprep.mubr.msk.f32.mxu0 %vm2625_vm5, %v2624_v46  ;;  %s2626_s19 = smov 96   ;;  %vm256_vm6 = vcmask 64512   ;;  %s2628_s20 = smov 120  }
  0x29   :  { %v2448_v19 = vpack.c.bf16 %v85_v18, %v84_v16  ;;  %v2192_v39 = vld [vmem:[%s3047_s11] ss:$0 sm:$0xff]  ;;  %v2802_v56 = vld [vmem:[#allocation5 + $0x8] sm:$0xff]  ;;  %v2810_v62 = vld [vmem:[#allocation5] sm:$0xff]  ;;  %s2629_s21 = smov 80   ;;  %s2630_s0 = smov 64  }
  0x2a   :  { %2445 = vmatprep.subr.bf16.mxu1 %v2444_v17  ;;  %v2193_v47 = vld [vmem:[%s3039_s3] ss:$0 sm:$0xff]  ;;  %vm81_vm7 = vcmp.eq.f32.partialorder %v2802_v56, 0.0  ;;  %s2627_s3 = smov 88   ;;  %vm80_vm8 = vcmp.eq.f32.partialorder %v2810_v62, 0.0  ;;  %s2631_s30 = smov 56  }
  0x2b   :  { %2447 = vmatpush3.bf16.msra.mxu1 %v2444_v17  ;;  %s2632_s1 = smov 112   ;;  %s2633_s22 = smov 48   ;;  %vm2087_vm13 = vcmask 523264  }
  0x2c   :  { %113 = vadd.xlane.f32.xlu0 %v112_v3  ;;  %2449 = vmatprep.subr.bf16.mxu1 %v2448_v19  ;;  %s2634_s25 = smov 72   ;;  %s2635_s26 = smov 104  }
  0x2d   :  { %s2636_s17 = smov 40  }
  0x2f   :  { %2451 = vmatpush3.bf16.msra.mxu1 %v2448_v19 }
  0x30   :  { %2314 = vmatprep.subr.mxu1 %v2624_v46 }
  0xb5   :  { %v111_v4 = vpop.xlane.xlu0 %110 }
  0xb6   :  { %v116_v5 = vmul.f32 0.03125, %v111_v4 }
  0xb8   :  { %v118_v6 = vsub.f32 %v2743_v0, %v116_v5 }
  0xb9   :  { %v114_v7 = vpop.xlane.xlu0 %113 }
  0xba   :  { %v117_v8 = vmul.f32 0.03125, %v114_v7  ;;  %v120_v9 = vmul.f32 %v118_v6, %v118_v6  ;;  %v150_v37 = vmul.f32 %v2191_v36, %v118_v6 }
  0xbc   :  { %v119_v10 = vsub.f32 %v2745_v1, %v117_v8  ;;  %v122_v11 = vsel %vm108_vm0, %v120_v9, 0.0 }
  0xbd   :  { %123 = vadd.xlane.f32.xlu1 %v122_v11 }
  0xbe   :  { %v121_v12 = vmul.f32 %v119_v10, %v119_v10  ;;  %v151_v41 = vmul.f32 %v2191_v36, %v119_v10 }
  0xc0   :  { %v125_v13 = vsel %vm108_vm0, %v121_v12, 0.0 }
  0xc1   :  { %126 = vadd.xlane.f32.xlu1 %v125_v13 }
 0x14a   :  { %v124_v20 = vpop.xlane.xlu1 %123 }
 0x14b   :  { %v128_v21 = vmul.f32 0.032258064, %v124_v20 }
 0x14d   :  { %2500 = vrsqrt.f32 %v128_v21  ;;  %vm132_vm1 = vcmp.eq.f32.partialorder %v128_v21, inf  ;;  %v135_v26 = vand.u32 2147483648, %v128_v21  ;;  %vm134_vm2 = vcmp.eq.f32.partialorder %v128_v21, 0.0 }
 0x14e   :  { %v127_v22 = vpop.xlane.xlu1 %126 }
 0x14f   :  { %v129_v23 = vmul.f32 0.032258064, %v127_v22 }
 0x151   :  { %2502 = vrsqrt.f32 %v129_v23  ;;  %vm139_vm3 = vcmp.eq.f32.partialorder %v129_v23, inf  ;;  %v142_v32 = vand.u32 2147483648, %v129_v23  ;;  %vm141_vm4 = vcmp.eq.f32.partialorder %v129_v23, 0.0 }
 0x157   :  { %v2501_v24 = vpop.eup %2500 }
 0x158   :  { %v131_v25 = vmul.f32 %v2501_v24, %v128_v21 }
 0x15a   :  { %v133_v27 = vsel %vm132_vm1, %v128_v21, %v131_v25 }
 0x15b   :  { %v2503_v28 = vpop.eup %2502  ;;  %v136_v29 = vsel %vm134_vm2, %v135_v26, %v133_v27 }
 0x15c   :  { %v138_v30 = vmul.f32 %v2503_v28, %v129_v23  ;;  %v152_v31 = vadd.f32 1e-06, %v136_v29 }
 0x15e   :  { %v140_v33 = vsel %vm139_vm3, %v129_v23, %v138_v30  ;;  %2504 = vrcp.f32 %v152_v31 }
 0x15f   :  { %v143_v34 = vsel %vm141_vm4, %v142_v32, %v140_v33 }
 0x160   :  { %v153_v35 = vadd.f32 1e-06, %v143_v34 }
 0x162   :  { %2506 = vrcp.f32 %v153_v35 }
 0x168   :  { %v2505_v38 = vpop.eup %2504 }
 0x169   :  { %v155_v40 = vmul.f32 %v2505_v38, %v150_v37 }
 0x16b   :  { %v164_v42 = vadd.f32 %v2192_v39, %v155_v40 }
 0x16c   :  { %v2507_v43 = vpop.eup %2506 }
 0x16d   :  { %v157_v44 = vmul.f32 %v2507_v43, %v151_v41  ;;  %2311 = vmatprep.mubr.msk.f32.mxu1 %vm108_vm0, %v164_v42 }
 0x16f   :  { %v165_v45 = vadd.f32 %v2192_v39, %v157_v44 }
 0x171   :  { %2312 = vmatmul.mubr.msk.f32.vlgmr.msra.gmra.mrb[0].mxu1 %vm108_vm0, %v165_v45 }
 0x172   :  { %2316 = vmatprep.mubr.msk.f32.mxu1 %vm2625_vm5, %v2624_v46 }
 0x244   :  { %v2313_v48 = vpop.f32.mrb[0].mxu1 }
 0x245   :  { %v2784_v49 = vadd.f32 %v2313_v48, %v2193_v47  ;;  %v244_v50 = vpop.f32.mrb[1].mxu1 }
 0x246   :  { %v2786_v51 = vadd.f32 %v2193_v47, %v244_v50 }
 0x247   :  { %332 = vrot.lane.b32.xlu1 %v2784_v49, %s2626_s19 }
 0x248   :  { %254 = vrot.lane.b32.xlu0 %v2786_v51, %s2626_s19 }
 0x2b9   :  { %v333_v53 = vpop.permute.xlu1 %332 }
 0x2ba   :  { %v255_v52 = vpop.permute.xlu0 %254 }
 0x2bb   :  { %2315 = vmatpush3.xpose.msk.msra.mxu1 %vm256_vm6, %v255_v52 }
 0x2bc   :  { %2319 = vmatprep.subr.mxu1 %v2624_v46 }
 0x2be   :  { %2317 = vmatmul.mubr.msk.f32.vlgmr.msra.gmra.mrb[2].mxu1 %vm256_vm6, %v2786_v51 }
 0x2bf   :  { %2320 = vmatpush3.xpose.msk.msra.mxu1 %vm256_vm6, %v333_v53  ;;  %2321 = vmatprep.mubr.msk.f32.mxu1 %vm2625_vm5, %v2624_v46 }
 0x2c0   :  { %2329 = vmatprep.subr.mxu1 %v2624_v46 }
 0x2c2   :  { %2322 = vmatmul.mubr.msk.f32.vlgmr.msra.gmra.mrb[4].mxu1 %vm256_vm6, %v2784_v49 }
 0x2c3   :  { %2331 = vmatprep.mubr.msk.f32.mxu1 %vm2625_vm5, %v2624_v46 }
 0x391   :  { %v327_v54 = vpop.f32.mrb[2].mxu1 }
 0x392   :  { %v2318_v55 = vpop.f32.mrb[3].mxu1  ;;  %v408_v63 = vmul.f32 0.35355338, %v327_v54 }
 0x394   :  { %v410_v2 = vsel %vm80_vm8, -1e-09, %v408_v63 }
 0x395   :  { %v404_v57 = vpop.f32.mrb[4].mxu1  ;;  %v412_v3 = vsel %vm256_vm6, %v410_v2, -inf }
 0x396   :  { %v409_v58 = vmul.f32 0.35355338, %v404_v57  ;;  %v2323_v59 = vpop.f32.mrb[5].mxu1 }
 0x398   :  { %v411_v60 = vsel %vm81_vm7, -1e-09, %v409_v58 }
 0x399   :  { %v415_v61 = vsel %vm256_vm6, %v411_v60, -inf }
 0x39a   :  { %416 = vmax.xlane.f32.xlu1 %v415_v61 }
 0x3ab   :  { %668 = vrot.lane.b32.xlu1 %v2784_v49, %s2627_s3 }
 0x3af   :  { %666 = vrot.lane.b32.xlu1 %v2784_v49, %s2628_s20 }
 0x3d3   :  { %413 = vmax.xlane.f32.xlu1 %v412_v3 }
 0x3e4   :  { %590 = vrot.lane.b32.xlu1 %v2786_v51, %s2627_s3 }
 0x3e8   :  { %588 = vrot.lane.b32.xlu1 %v2786_v51, %s2628_s20 }
 0x3ec   :  { %1088 = vrot.lane.b32.xlu1 %v2786_v51, %s2629_s21 }
 0x427   :  { %v417_v4 = vpop.xlane.xlu1 %416 }
 0x428   :  { %v419_v5 = vsub.f32 %v411_v60, %v417_v4 }
 0x42a   :  { %v422_v6 = vmul.f32 1.442695, %v419_v5 }
 0x42b   :  { %v669_v9 = vpop.permute.xlu1 %668 }
 0x42c   :  { %2508 = vpow2.f32 %v422_v6 }
 0x42f   :  { %v667_v10 = vpop.permute.xlu1 %666 }
 0x436   :  { %v2509_v7 = vpop.eup %2508 }
 0x437   :  { %v427_v8 = vsel %vm256_vm6, %v2509_v7, 0.0 }
 0x438   :  { %428 = vadd.xlane.f32.xlu0 %v427_v8 }
 0x44e   :  { %512 = vrot.lane.b32.xlu0 %v2784_v49, %s2630_s0 }
 0x460   :  { %v414_v11 = vpop.xlane.xlu1 %413 }
 0x461   :  { %v418_v12 = vsub.f32 %v410_v2, %v414_v11 }
 0x463   :  { %v420_v13 = vmul.f32 1.442695, %v418_v12 }
 0x464   :  { %v591_v23 = vpop.permute.xlu1 %590 }
 0x465   :  { %2510 = vpow2.f32 %v420_v13 }
 0x468   :  { %v589_v25 = vpop.permute.xlu1 %588 }
 0x46c   :  { %v1089_v47 = vpop.permute.xlu1 %1088 }
 0x46f   :  { %v2511_v14 = vpop.eup %2510 }
 0x470   :  { %v424_v15 = vsel %vm256_vm6, %v2511_v14, 0.0 }
 0x471   :  { %425 = vadd.xlane.f32.xlu0 %v424_v15 }
 0x487   :  { %436 = vrot.lane.b32.xlu0 %v2786_v51, %s2630_s0 }
 0x4c5   :  { %v429_v16 = vpop.xlane.xlu0 %428 }
 0x4c6   :  { %2512 = vrcp.f32 %v429_v16 }
 0x4c9   :  { %v513_v17 = vpop.permute.xlu0 %512 }
 0x4ca   :  { %2330 = vmatpush3.msra.mxu1 %v513_v17 }
 0x4cb   :  { %2339 = vmatprep.subr.mxu1 %v2624_v46 }
 0x4d0   :  { %v2513_v18 = vpop.eup %2512 }
 0x4d1   :  { %v435_v19 = vmul.f32 %v2513_v18, %v2509_v7  ;;  %v88_v18 = vld [vmem:[%s3040_s4 + $0x8] sm:$0xff] }
 0x4d3   :  { %2332 = vmatmul.mubr.msk.f32.vlgmr.msra.gmra.mrb[6].mxu1 %vm256_vm6, %v435_v19  ;;  %v87_v19 = vld [vmem:[%s3040_s4] sm:$0xff] }
 0x4d4   :  { %2340 = vmatpush3.xpose.msk.msra.mxu1 %vm256_vm6, %v669_v9  ;;  %2341 = vmatprep.mubr.msk.f32.mxu1 %vm2625_vm5, %v2624_v46 }
 0x4d5   :  { %2349 = vmatprep.subr.mxu1 %v2624_v46 }
 0x4d7   :  { %2342 = vmatmul.mubr.msk.f32.vlgmr.msra.gmra.mrb[8].mxu1 %vm256_vm6, %v667_v10 }
 0x4d8   :  { %2351 = vmatprep.mubr.msk.f32.mxu1 %vm2625_vm5, %v2624_v46 }
 0x4fe   :  { %v426_v20 = vpop.xlane.xlu0 %425 }
 0x4ff   :  { %2514 = vrcp.f32 %v426_v20 }
 0x502   :  { %v437_v21 = vpop.permute.xlu0 %436 }
 0x503   :  { %2325 = vmatpush3.msra.mxu0 %v437_v21 }
 0x504   :  { %2334 = vmatprep.subr.mxu0 %v2624_v46 }
 0x509   :  { %v2515_v22 = vpop.eup %2514 }
 0x50a   :  { %v434_v24 = vmul.f32 %v2515_v22, %v2511_v14 }
 0x50c   :  { %2327 = vmatmul.mubr.msk.f32.vlgmr.msra.gmra.mrb[0].mxu0 %vm256_vm6, %v434_v24 }
 0x50d   :  { %2335 = vmatpush3.xpose.msk.msra.mxu0 %vm256_vm6, %v591_v23  ;;  %2336 = vmatprep.mubr.msk.f32.mxu0 %vm2625_vm5, %v2624_v46 }
 0x50e   :  { %2344 = vmatprep.subr.mxu0 %v2624_v46 }
 0x510   :  { %2337 = vmatmul.mubr.msk.f32.vlgmr.msra.gmra.mrb[2].mxu0 %vm256_vm6, %v589_v25 }
 0x511   :  { %2346 = vmatprep.mubr.msk.f32.mxu0 %vm2625_vm5, %v2624_v46 }
 0x5a6   :  { %v2842_v26 = vpop.f32.mrb[6].mxu1 }
 0x5a7   :  { %v2333_v27 = vpop.f32.mrb[7].mxu1 }
 0x5aa   :  { %v740_v28 = vpop.f32.mrb[8].mxu1 }
 0x5ab   :  { %v745_v29 = vmul.f32 0.35355338, %v740_v28  ;;  %v2343_v30 = vpop.f32.mrb[9].mxu1 }
 0x5ad   :  { %v747_v31 = vsel %vm81_vm7, -1e-09, %v745_v29 }
 0x5ae   :  { %v751_v32 = vsel %vm256_vm6, %v747_v31, -inf }
 0x5af   :  { %752 = vmax.xlane.f32.xlu0 %v751_v32 }
 0x5c5   :  { %848 = vrot.lane.b32.xlu0 %v2784_v49, %s2631_s30 }
 0x5c9   :  { %1086 = vrot.lane.b32.xlu0 %v2786_v51, %s2632_s1 }
 0x5cd   :  { %1164 = vrot.lane.b32.xlu0 %v2784_v49, %s2632_s1 }
 0x5df   :  { %v2851_v33 = vpop.f32.mrb[0].mxu0 }
 0x5e0   :  { %v2328_v34 = vpop.f32.mrb[1].mxu0 }
 0x5e3   :  { %v662_v35 = vpop.f32.mrb[2].mxu0 }
 0x5e4   :  { %v2338_v36 = vpop.f32.mrb[3].mxu0  ;;  %v744_v43 = vmul.f32 0.35355338, %v662_v35 }
 0x5e5   :  { %v89_v36 = vld [vmem:[%s3040_s4 + $0x10] sm:$0xff] }
 0x5e6   :  { %v746_v44 = vsel %vm80_vm8, -1e-09, %v744_v43 }
 0x5e7   :  { %v748_v45 = vsel %vm256_vm6, %v746_v44, -inf }
 0x63c   :  { %v753_v37 = vpop.xlane.xlu0 %752 }
 0x63d   :  { %v755_v38 = vsub.f32 %v747_v31, %v753_v37 }
 0x63f   :  { %v758_v39 = vmul.f32 1.442695, %v755_v38 }
 0x640   :  { %v849_v40 = vpop.permute.xlu0 %848 }
 0x641   :  { %2516 = vpow2.f32 %v758_v39  ;;  %2350 = vmatpush3.msra.mxu1 %v849_v40 }
 0x642   :  { %2364 = vmatprep.subr.mxu1 %v2624_v46 }
 0x644   :  { %v1087_v53 = vpop.permute.xlu0 %1086 }
 0x648   :  { %v1165_v55 = vpop.permute.xlu0 %1164 }
 0x64b   :  { %v2517_v41 = vpop.eup %2516 }
 0x64c   :  { %v763_v42 = vsel %vm256_vm6, %v2517_v41, 0.0 }
 0x64d   :  { %764 = vadd.xlane.f32.xlu1 %v763_v42 }
 0x65e   :  { %1166 = vrot.lane.b32.xlu1 %v2784_v49, %s2629_s21 }
 0x682   :  { %749 = vmax.xlane.f32.xlu1 %v748_v45 }
 0x6da   :  { %v765_v48 = vpop.xlane.xlu1 %764 }
 0x6db   :  { %2518 = vrcp.f32 %v765_v48 }
 0x6de   :  { %v1167_v54 = vpop.permute.xlu1 %1166 }
 0x6e5   :  { %v2519_v50 = vpop.eup %2518 }
 0x6e6   :  { %v771_v52 = vmul.f32 %v2519_v50, %v2517_v41 }
 0x6e8   :  { %2352 = vmatmul.mubr.msk.f32.vlgmr.msra.gmra.mrb[10].mxu1 %vm256_vm6, %v771_v52 }
 0x6e9   :  { %2365 = vmatpush3.xpose.msk.msra.mxu1 %vm256_vm6, %v1089_v47  ;;  %2366 = vmatprep.mubr.msk.f32.mxu1 %vm2625_vm5, %v2624_v46 }
 0x6ea   :  { %2369 = vmatprep.subr.mxu1 %v2624_v46 }
 0x6ec   :  { %2367 = vmatmul.mubr.msk.f32.vlgmr.msra.gmra.mrb[12].mxu1 %vm256_vm6, %v1087_v53 }
 0x6ed   :  { %2370 = vmatpush3.xpose.msk.msra.mxu1 %vm256_vm6, %v1167_v54  ;;  %2371 = vmatprep.mubr.msk.f32.mxu1 %vm2625_vm5, %v2624_v46 }
 0x6ee   :  { %2379 = vmatprep.subr.mxu1 %v2624_v46 }
 0x6f0   :  { %2372 = vmatmul.mubr.msk.f32.vlgmr.msra.gmra.mrb[14].mxu1 %vm256_vm6, %v1165_v55 }
 0x6f1   :  { %2381 = vmatprep.mubr.msk.f32.mxu1 %vm2625_vm5, %v2624_v46 }
 0x70f   :  { %v750_v57 = vpop.xlane.xlu1 %749 }
 0x710   :  { %v754_v58 = vsub.f32 %v746_v44, %v750_v57 }
 0x712   :  { %v756_v59 = vmul.f32 1.442695, %v754_v58 }
 0x714   :  { %2520 = vpow2.f32 %v756_v59 }
 0x71e   :  { %v2521_v60 = vpop.eup %2520 }
 0x71f   :  { %v760_v61 = vsel %vm256_vm6, %v2521_v60, 0.0 }
 0x720   :  { %761 = vadd.xlane.f32.xlu0 %v760_v61 }
 0x736   :  { %772 = vrot.lane.b32.xlu0 %v2786_v51, %s2631_s30 }
 0x73a   :  { %1346 = vrot.lane.b32.xlu0 %v2784_v49, %s2633_s22 }
 0x73e   :  { %1507 = vrot.lane.b32.xlu0 %v2786_v51, %s2634_s25 }
 0x742   :  { %1585 = vrot.lane.b32.xlu0 %v2784_v49, %s2634_s25 }
 0x746   :  { %1505 = vrot.lane.b32.xlu0 %v2786_v51, %s2635_s26 }
 0x7ad   :  { %v762_v63 = vpop.xlane.xlu0 %761 }
 0x7ae   :  { %2522 = vrcp.f32 %v762_v63 }
 0x7b1   :  { %v773_v2 = vpop.permute.xlu0 %772 }
 0x7b2   :  { %2345 = vmatpush3.msra.mxu0 %v773_v2 }
 0x7b3   :  { %2354 = vmatprep.subr.mxu0 %v88_v18 }
 0x7b5   :  { %v1347_v3 = vpop.permute.xlu0 %1346 }
 0x7b6   :  { %2380 = vmatpush3.msra.mxu1 %v1347_v3 }
 0x7b7   :  { %2389 = vmatprep.subr.mxu1 %v2624_v46 }
 0x7b8   :  { %v2523_v4 = vpop.eup %2522 }
 0x7b9   :  { %v770_v5 = vmul.f32 %v2523_v4, %v2521_v60  ;;  %v1508_v38 = vpop.permute.xlu0 %1507 }
 0x7bb   :  { %2347 = vmatmul.mubr.msk.f32.vlgmr.msra.gmra.mrb[4].mxu0 %vm256_vm6, %v770_v5  ;;  %v920_v6 = vpop.f32.mrb[10].mxu1 }
 0x7bc   :  { %v2353_v7 = vpop.f32.mrb[11].mxu1  ;;  %2355 = vmatpush3.msra.mxu0 %v88_v18 }
 0x7bd   :  { %2359 = vmatprep.subr.mxu0 %v87_v19  ;;  %v1586_v40 = vpop.permute.xlu0 %1585 }
 0x7bf   :  { %v1160_v8 = vpop.f32.mrb[12].mxu1 }
 0x7c0   :  { %v1242_v9 = vmul.f32 0.35355338, %v1160_v8  ;;  %v2368_v10 = vpop.f32.mrb[13].mxu1 }
 0x7c1   :  { %v1506_v42 = vpop.permute.xlu0 %1505 }
 0x7c2   :  { %v1244_v11 = vsel %vm80_vm8, -1e-09, %v1242_v9 }
 0x7c3   :  { %v1238_v12 = vpop.f32.mrb[14].mxu1  ;;  %v1246_v13 = vsel %vm256_vm6, %v1244_v11, -inf }
 0x7c4   :  { %v1243_v14 = vmul.f32 0.35355338, %v1238_v12  ;;  %1247 = vmax.xlane.f32.xlu1 %v1246_v13  ;;  %v2373_v15 = vpop.f32.mrb[15].mxu1 }
 0x7c5   :  { %v90_v15 = vld [vmem:[%s3040_s4 + $0x18] sm:$0xff] }
 0x7c6   :  { %v1245_v16 = vsel %vm81_vm7, -1e-09, %v1243_v14 }
 0x7c7   :  { %v1249_v17 = vsel %vm256_vm6, %v1245_v16, -inf }
 0x7c8   :  { %1250 = vmax.xlane.f32.xlu1 %v1249_v17 }
 0x851   :  { %v1248_v20 = vpop.xlane.xlu1 %1247 }
 0x852   :  { %v1252_v21 = vsub.f32 %v1244_v11, %v1248_v20 }
 0x854   :  { %v1254_v22 = vmul.f32 1.442695, %v1252_v21 }
 0x855   :  { %v1251_v23 = vpop.xlane.xlu1 %1250 }
 0x856   :  { %2524 = vpow2.f32 %v1254_v22  ;;  %v1253_v24 = vsub.f32 %v1245_v16, %v1251_v23 }
 0x858   :  { %v1256_v25 = vmul.f32 1.442695, %v1253_v24 }
 0x85a   :  { %2526 = vpow2.f32 %v1256_v25 }
 0x860   :  { %v2525_v27 = vpop.eup %2524 }
 0x861   :  { %v1258_v28 = vsel %vm256_vm6, %v2525_v27, 0.0 }
 0x862   :  { %1259 = vadd.xlane.f32.xlu1 %v1258_v28 }
 0x864   :  { %v2527_v29 = vpop.eup %2526 }
 0x865   :  { %v1261_v30 = vsel %vm256_vm6, %v2527_v29, 0.0 }
 0x866   :  { %1262 = vadd.xlane.f32.xlu1 %v1261_v30 }
 0x877   :  { %1270 = vrot.lane.b32.xlu1 %v2786_v51, %s2633_s22 }
 0x87b   :  { %1583 = vrot.lane.b32.xlu1 %v2784_v49, %s2635_s26 }
 0x88e   :  { %v844_v31 = vpop.f32.mrb[4].mxu0 }
 0x88f   :  { %v2348_v32 = vpop.f32.mrb[5].mxu0  ;;  %2356 = vmatprep.mubr.msk.f32.mxu0 %vm256_vm6, %v844_v31 }
 0x890   :  { %2357 = vmatmul.mubr.msk.f32.vlgmr.msra.gmra.mrb[6].mxu0 %vm256_vm6, %v920_v6 }
 0x891   :  { %2361 = vmatprep.mubr.msk.f32.mxu0 %vm256_vm6, %v2851_v33  ;;  %2360 = vmatpush3.msra.mxu0 %v87_v19  ;;  %v2228_v19 = vld [vmem:[%s3041_s5] ss:$0 sm:$0xff] }
 0x892   :  { %2374 = vmatprep.subr.mxu0 %v2624_v46 }
 0x898   :  { %2362 = vmatmul.mubr.msk.f32.vlgmr.msra.gmra.mrb[6].mxu0 %vm256_vm6, %v2842_v26 }
 0x899   :  { %2376 = vmatprep.mubr.msk.f32.mxu0 %vm2625_vm5, %v2624_v46 }
 0x8ef   :  { %v1260_v34 = vpop.xlane.xlu1 %1259 }
 0x8f0   :  { %2528 = vrcp.f32 %v1260_v34 }
 0x8f3   :  { %v1263_v35 = vpop.xlane.xlu1 %1262 }
 0x8f4   :  { %2530 = vrcp.f32 %v1263_v35 }
 0x8f7   :  { %v1271_v37 = vpop.permute.xlu1 %1270 }
 0x8f8   :  { %2375 = vmatpush3.msra.mxu0 %v1271_v37 }
 0x8f9   :  { %2384 = vmatprep.subr.mxu0 %v89_v36 }
 0x8fa   :  { %v2529_v33 = vpop.eup %2528 }
 0x8fb   :  { %v1268_v39 = vmul.f32 %v2529_v33, %v2525_v27  ;;  %v1584_v48 = vpop.permute.xlu1 %1583  ;;  %v93_v33 = vld [vmem:[%s3042_s6 + $0x8] sm:$0xff] }
 0x8fd   :  { %2377 = vmatmul.mubr.msk.f32.vlgmr.msra.gmra.mrb[8].mxu0 %vm256_vm6, %v1268_v39  ;;  %v94_v39 = vld [vmem:[%s3042_s6 + $0x10] sm:$0xff] }
 0x8fe   :  { %v2531_v26 = vpop.eup %2530  ;;  %2385 = vmatpush3.msra.mxu0 %v89_v36 }
 0x8ff   :  { %v1269_v41 = vmul.f32 %v2531_v26, %v2527_v29  ;;  %2394 = vmatprep.subr.mxu0 %v2624_v46 }
 0x901   :  { %2382 = vmatmul.mubr.msk.f32.vlgmr.msra.gmra.mrb[16].mxu1 %vm256_vm6, %v1269_v41 }
 0x902   :  { %2390 = vmatpush3.xpose.msk.msra.mxu1 %vm256_vm6, %v1508_v38  ;;  %2391 = vmatprep.mubr.msk.f32.mxu1 %vm2625_vm5, %v2624_v46  ;;  %v92_v38 = vld [vmem:[%s3042_s6] sm:$0xff] }
 0x903   :  { %2399 = vmatprep.subr.mxu1 %v2624_v46  ;;  %v2452_v26 = vpack.c.bf16 %v93_v33, %v92_v38 }
 0x905   :  { %2392 = vmatmul.mubr.msk.f32.vlgmr.msra.gmra.mrb[18].mxu1 %vm256_vm6, %v1506_v42  ;;  %v97_v42 = vld [vmem:[%s3044_s8] sm:$0xff] }
 0x906   :  { %2401 = vmatprep.mubr.msk.f32.mxu1 %vm2625_vm5, %v2624_v46 }
 0x9d0   :  { %v1342_v43 = vpop.f32.mrb[8].mxu0 }
 0x9d1   :  { %v2378_v44 = vpop.f32.mrb[9].mxu0  ;;  %2386 = vmatprep.mubr.msk.f32.mxu0 %vm256_vm6, %v1342_v43  ;;  %v98_v43 = vld [vmem:[%s3044_s8 + $0x8] sm:$0xff] }
 0x9d2   :  { %v99_v44 = vld [vmem:[%s3044_s8 + $0x10] sm:$0xff] }
 0x9d4   :  { %v1418_v45 = vpop.f32.mrb[16].mxu1 }
 0x9d5   :  { %v2383_v47 = vpop.f32.mrb[17].mxu1  ;;  %2387 = vmatmul.mubr.msk.f32.vlgmr.msra.gmra.mrb[6].mxu0 %vm256_vm6, %v1418_v45  ;;  %v2460_v45 = vpack.c.bf16 %v98_v43, %v97_v42 }
 0x9d6   :  { %2395 = vmatpush3.xpose.msk.msra.mxu0 %vm256_vm6, %v1586_v40  ;;  %2396 = vmatprep.mubr.msk.f32.mxu0 %vm2625_vm5, %v2624_v46  ;;  %v95_v40 = vld [vmem:[%s3042_s6 + $0x18] sm:$0xff] }
 0x9d7   :  { %2404 = vmatprep.subr.mxu0 %v2624_v46  ;;  %v2456_v41 = vpack.c.bf16 %v95_v40, %v94_v39  ;;  %v100_v47 = vld [vmem:[%s3044_s8 + $0x18] sm:$0xff] }
 0x9d8   :  { %v1579_v50 = vpop.f32.mrb[18].mxu1 }
 0x9d9   :  { %v1661_v52 = vmul.f32 0.35355338, %v1579_v50  ;;  %v2393_v53 = vpop.f32.mrb[19].mxu1  ;;  %2397 = vmatmul.mubr.msk.f32.vlgmr.msra.gmra.mrb[10].mxu0 %vm256_vm6, %v1584_v48  ;;  %v2464_v48 = vpack.c.bf16 %v100_v47, %v99_v44  ;;  %v101_v50 = vld [vmem:[%s3044_s8 + $0x20] sm:$0xff] }
 0x9da   :  { %2406 = vmatprep.mubr.msk.f32.mxu0 %vm2625_vm5, %v2624_v46 }
 0x9db   :  { %v1663_v54 = vsel %vm80_vm8, -1e-09, %v1661_v52  ;;  %v102_v52 = vld [vmem:[%s3044_s8 + $0x28] sm:$0xff] }
 0x9dc   :  { %v1665_v55 = vsel %vm256_vm6, %v1663_v54, -inf  ;;  %v2468_v53 = vpack.c.bf16 %v102_v52, %v101_v50 }
 0x9dd   :  { %1666 = vmax.xlane.f32.xlu0 %v1665_v55 }
 0xa6a   :  { %v1667_v57 = vpop.xlane.xlu0 %1666 }
 0xa6b   :  { %v1671_v58 = vsub.f32 %v1663_v54, %v1667_v57 }
 0xa6d   :  { %v1673_v59 = vmul.f32 1.442695, %v1671_v58 }
 0xa6f   :  { %2532 = vpow2.f32 %v1673_v59 }
 0xa79   :  { %v2533_v60 = vpop.eup %2532 }
 0xa7a   :  { %v1677_v61 = vsel %vm256_vm6, %v2533_v60, 0.0 }
 0xa7b   :  { %1678 = vadd.xlane.f32.xlu0 %v1677_v61 }
 0xaac   :  { %v1657_v63 = vpop.f32.mrb[10].mxu0 }
 0xaad   :  { %v1662_v2 = vmul.f32 0.35355338, %v1657_v63  ;;  %v2398_v3 = vpop.f32.mrb[11].mxu0 }
 0xaaf   :  { %v1664_v46 = vsel %vm81_vm7, -1e-09, %v1662_v2 }
 0xab0   :  { %v1668_v62 = vsel %vm256_vm6, %v1664_v46, -inf }
 0xab1   :  { %1669 = vmax.xlane.f32.xlu1 %v1668_v62 }
 0xac2   :  { %1765 = vrot.lane.b32.xlu1 %v2784_v49, %s2636_s17 }
 0xb08   :  { %v1679_v56 = vpop.xlane.xlu0 %1678 }
 0xb3e   :  { %v1670_v4 = vpop.xlane.xlu1 %1669 }
 0xb3f   :  { %v1672_v5 = vsub.f32 %v1664_v46, %v1670_v4 }
 0xb41   :  { %v1675_v6 = vmul.f32 1.442695, %v1672_v5 }
 0xb42   :  { %v1766_v7 = vpop.permute.xlu1 %1765 }
 0xb43   :  { %2534 = vpow2.f32 %v1675_v6  ;;  %2405 = vmatpush3.msra.mxu0 %v1766_v7 }
 0xb44   :  { %2536 = vrcp.f32 %v1679_v56  ;;  %2409 = vmatprep.subr.mxu0 %v90_v15 }
 0xb4d   :  { %v2535_v8 = vpop.eup %2534 }
 0xb4e   :  { %v1680_v9 = vsel %vm256_vm6, %v2535_v8, 0.0  ;;  %v2537_v11 = vpop.eup %2536 }
 0xb4f   :  { %1681 = vadd.xlane.f32.xlu0 %v1680_v9  ;;  %v1687_v12 = vmul.f32 %v2537_v11, %v2533_v60 }
 0xb65   :  { %1689 = vrot.lane.b32.xlu0 %v2786_v51, %s2636_s17 }
 0xbdc   :  { %v1682_v10 = vpop.xlane.xlu0 %1681 }
 0xbdd   :  { %2538 = vrcp.f32 %v1682_v10 }
 0xbe0   :  { %v1690_v13 = vpop.permute.xlu0 %1689 }
 0xbe1   :  { %2400 = vmatpush3.msra.mxu1 %v1690_v13 }
 0xbe2   :  { %2402 = vmatmul.mubr.msk.f32.vlgmr.msra.gmra.mrb[20].mxu1 %vm256_vm6, %v1687_v12  ;;  %2453 = vmatprep.subr.bf16.mxu1 %v2452_v26  ;;  %v2230_v12 = vld [vmem:[%s3049_s13] ss:$0 sm:$0xff] }
 0xbe3   :  { %2455 = vmatpush3.bf16.msra.mxu1 %v2452_v26 }
 0xbe4   :  { %2457 = vmatprep.subr.bf16.mxu1 %v2456_v41 }
 0xbe7   :  { %v2539_v49 = vpop.eup %2538  ;;  %2459 = vmatpush3.bf16.msra.mxu1 %v2456_v41 }
 0xbe8   :  { %v1688_v14 = vmul.f32 %v2539_v49, %v2535_v8  ;;  %v2229_v8 = vld [vmem:[%s3048_s12] ss:$0 sm:$0xff] }
 0xbea   :  { %2407 = vmatmul.mubr.msk.f32.vlgmr.msra.gmra.mrb[12].mxu0 %vm256_vm6, %v1688_v14 }
 0xbeb   :  { %2410 = vmatpush3.msra.mxu0 %v90_v15 }
 0xbec   :  { %2461 = vmatprep.subr.bf16.mxu0 %v2460_v45 }
 0xcb5   :  { %v1761_v51 = vpop.f32.mrb[20].mxu1 }
 0xcb6   :  { %v2403_v16 = vpop.f32.mrb[21].mxu1  ;;  %2411 = vmatprep.mubr.msk.f32.mxu0 %vm256_vm6, %v1761_v51  ;;  %v103_v51 = vld [vmem:[%s3044_s8 + $0x30] sm:$0xff] }
 0xcb7   :  { %v104_v16 = vld [vmem:[%s3044_s8 + $0x38] sm:$0xff]  ;;  %s2637_s8 = smov [#allocation7]  }
 0xcb8   :  { %s2178_s1 = sshll.u32 %s2637_s8, 4  ;;  %s2179_s1 = int_to_ptr.vmem [resolvable:$true] %s2178_s1 }
 0xcb9   :  { %p2597_p3 = scmp.lt.s32.totalorder %s2179_s1, %s2179_s1 }
 0xcbd   :  { %v1837_v17 = vpop.f32.mrb[12].mxu0 }
 0xcbe   :  { %v2408_v18 = vpop.f32.mrb[13].mxu0  ;;  %2412 = vmatmul.mubr.msk.f32.vlgmr.msra.gmra.mrb[6].mxu0 %vm256_vm6, %v1837_v17  ;;  %v2472_v17 = vpack.c.bf16 %v104_v16, %v103_v51 }
 0xcbf   :  { %2463 = vmatpush3.bf16.msra.mxu0 %v2460_v45  ;;  %v2231_v18 = vld [vmem:[%s3043_s7] ss:$0 sm:$0xff]  ;;  %s2592_s7 = scalar_lea.vmem %s2179_s1, 256 }
 0xcc0   :  { %2465 = vmatprep.subr.bf16.mxu0 %v2464_v48  ;;  %p2593_p2 = scmp.ne.s32.totalorder %s2179_s1, %s2592_s7  ;;  %p2598_p4 = scmp.lt.s32.totalorder %s2592_s7, %s2592_s7 }
 0xcc2   :  { %p2599_p5 = por %p2598_p4, %p2597_p3 }
 0xcc3   :  { %2467 = vmatpush3.bf16.msra.mxu0 %v2464_v48 }
 0xcc4   :  { %2469 = vmatprep.subr.bf16.mxu0 %v2468_v53  ;;  %p2600_p6 = pnand %p2599_p5, %p2593_p2 }
 0xcc7   :  { %2471 = vmatpush3.bf16.msra.mxu0 %v2468_v53 }
 0xcc8   :  { %2473 = vmatprep.subr.bf16.mxu0 %v2472_v17 }
 0xccb   :  { %2475 = vmatpush3.bf16.msra.mxu0 %v2472_v17 }
 0xd91   :  { %v2413_v20 = vpop.f32.mrb[6].mxu0 }
 0xd92   :  { %v1931_v21 = vadd.f32 %v2413_v20, %v2228_v19  ;;  %v1913_v22 = vpop.f32.mrb[7].mxu0 }
 0xd93   :  { %v1930_v23 = vadd.f32 %v2228_v19, %v1913_v22 }
 0xd94   :  { %v2954_v24 = vadd.f32 %v1931_v21, %v2745_v1 }
 0xd95   :  { %v2957_v25 = vadd.f32 %v1930_v23, %v2743_v0 }
 0xd96   :  { %v1939_v27 = vsel %vm108_vm0, %v2954_v24, 0.0 }
 0xd97   :  { %1940 = vadd.xlane.f32.xlu0 %v1939_v27  ;;  %v1936_v28 = vsel %vm108_vm0, %v2957_v25, 0.0 }
 0xd98   :  { %1937 = vadd.xlane.f32.xlu1 %v1936_v28  ;;  %v2234_v28 = vld [vmem:[%s3045_s9] ss:$0 sm:$0xff] }
 0xe24   :  { %v1941_v29 = vpop.xlane.xlu0 %1940 }
 0xe25   :  { %v1943_v30 = vmul.f32 0.03125, %v1941_v29  ;;  %v1938_v31 = vpop.xlane.xlu1 %1937 }
 0xe26   :  { %v1942_v32 = vmul.f32 0.03125, %v1938_v31 }
 0xe27   :  { %v1945_v34 = vsub.f32 %v2954_v24, %v1943_v30 }
 0xe28   :  { %v1944_v1 = vsub.f32 %v2957_v25, %v1942_v32 }
 0xe29   :  { %v1947_v35 = vmul.f32 %v1945_v34, %v1945_v34  ;;  %v1977_v9 = vmul.f32 %v2229_v8, %v1945_v34 }
 0xe2a   :  { %v1946_v36 = vmul.f32 %v1944_v1, %v1944_v1  ;;  %v1976_v10 = vmul.f32 %v2229_v8, %v1944_v1 }
 0xe2b   :  { %v1951_v0 = vsel %vm108_vm0, %v1947_v35, 0.0 }
 0xe2c   :  { %1952 = vadd.xlane.f32.xlu1 %v1951_v0  ;;  %v1948_v37 = vsel %vm108_vm0, %v1946_v36, 0.0 }
 0xe2d   :  { %1949 = vadd.xlane.f32.xlu0 %v1948_v37 }
 0xeb9   :  { %v1953_v54 = vpop.xlane.xlu1 %1952 }
 0xeba   :  { %v1955_v55 = vmul.f32 0.032258064, %v1953_v54  ;;  %v1950_v57 = vpop.xlane.xlu0 %1949 }
 0xebb   :  { %v1954_v58 = vmul.f32 0.032258064, %v1950_v57 }
 0xebc   :  { %2540 = vrsqrt.f32 %v1955_v55  ;;  %vm1965_vm9 = vcmp.eq.f32.partialorder %v1955_v55, inf  ;;  %v1968_v63 = vand.u32 2147483648, %v1955_v55  ;;  %vm1967_vm10 = vcmp.eq.f32.partialorder %v1955_v55, 0.0 }
 0xebd   :  { %2542 = vrsqrt.f32 %v1954_v58  ;;  %vm1958_vm11 = vcmp.eq.f32.partialorder %v1954_v58, inf  ;;  %v1961_v46 = vand.u32 2147483648, %v1954_v58  ;;  %vm1960_vm12 = vcmp.eq.f32.partialorder %v1954_v58, 0.0 }
 0xec6   :  { %v2541_v59 = vpop.eup %2540 }
 0xec7   :  { %v2543_v60 = vpop.eup %2542  ;;  %v1964_v61 = vmul.f32 %v2541_v59, %v1955_v55 }
 0xec8   :  { %v1957_v2 = vmul.f32 %v2543_v60, %v1954_v58 }
 0xec9   :  { %v1966_v3 = vsel %vm1965_vm9, %v1955_v55, %v1964_v61 }
 0xeca   :  { %v1969_v62 = vsel %vm1967_vm10, %v1968_v63, %v1966_v3  ;;  %v1959_v4 = vsel %vm1958_vm11, %v1954_v58, %v1957_v2 }
 0xecb   :  { %v1979_v5 = vadd.f32 1e-06, %v1969_v62  ;;  %v1962_v6 = vsel %vm1960_vm12, %v1961_v46, %v1959_v4 }
 0xecc   :  { %v1978_v7 = vadd.f32 1e-06, %v1962_v6 }
 0xecd   :  { %2544 = vrcp.f32 %v1979_v5 }
 0xece   :  { %2546 = vrcp.f32 %v1978_v7 }
 0xed7   :  { %v2545_v56 = vpop.eup %2544 }
 0xed8   :  { %v2547_v11 = vpop.eup %2546  ;;  %v1983_v13 = vmul.f32 %v2545_v56, %v1977_v9 }
 0xed9   :  { %v1981_v49 = vmul.f32 %v2547_v11, %v1976_v10 }
 0xeda   :  { %v1991_v15 = vadd.f32 %v2230_v12, %v1983_v13 }
 0xedb   :  { %v1990_v14 = vadd.f32 %v2230_v12, %v1981_v49 }
 0xedd   :  { %2422 = vmatprep.mubr.msk.f32.mxu1 %vm108_vm0, %v1990_v14 }
 0xede   :  { %2423 = vmatmul.mubr.msk.f32.vlgmr.msra.gmra.mrb[22].mxu1 %vm108_vm0, %v1991_v15 }
 0xfb1   :  { %v2424_v19 = vpop.f32.mrb[22].mxu1 }
 0xfb2   :  { %v2076_v20 = vadd.f32 %v2424_v19, %v2231_v18  ;;  %v2070_v21 = vpop.f32.mrb[23].mxu1 }
 0xfb3   :  { %v2071_v22 = vadd.f32 %v2231_v18, %v2070_v21 }
 0xfb4   :  { %v2080_v27 = vmax.f32 %v2076_v20, 0.0 }
 0xfb5   :  { %v2079_v23 = vmax.f32 %v2071_v22, 0.0 }
 0xfb7   :  { %2441 = vmatprep.mubr.msk.f32.mxu0 %vm2087_vm13, %v2079_v23 }
 0xfb8   :  { %2442 = vmatmul.mubr.msk.f32.vlgmr.msra.gmra.mrb[14].mxu0 %vm2087_vm13, %v2080_v27 }
0x108b   :  { %v2443_v29 = vpop.f32.mrb[14].mxu0 }
0x108c   :  { %v2166_v30 = vadd.f32 %v2443_v29, %v2234_v28  ;;  %v2160_v31 = vpop.f32.mrb[15].mxu0 }
0x108d   :  { %v2161_v32 = vadd.f32 %v2234_v28, %v2160_v31 }
0x108e   :  { %v2170_v34 = vadd.f32 %v2166_v30, %v2954_v24 }
0x108f   :  { %v2169_v1 = vadd.f32 %v2161_v32, %v2957_v25 }
0x1090   :  { %2172 = vst.msk [vmem:[#allocation7 + $0x8] sm:$0xff] %vm108_vm0, %v2170_v34 }
0x1091   :  { %2171 = vst.msk [vmem:[#allocation7] sm:$0xff] %vm108_vm0, %v2169_v1 }
0x1092   :  { %2603 = shalt.err (!%p2600_p6)
}
0x1093   :  { %s2604_s25 = scalar_lea.hbm %s3050_s14, 256 }
0x1094   :  { %p2605_p7 = scmp.ne.s32.totalorder %s3050_s14, %s2604_s25  ;;  %p2608_p8 = scmp.lt.u32.totalorder %s2604_s25, %s3050_s14 }
0x1096   :  { %p2610_p9 = pnand %p2608_p8, %p2605_p7 }
0x1098   :  { %2613 = shalt.err (!%p2610_p9)
}
0x1099   :  { %2184 = dma.vmem_to_hbm [thread:$0]  %s2179_s1, 256, %s3050_s14, [#allocation4], %s2621_s23, %s2621_s23, %s2622_s24  }
0x109a   :  { %2618 = dma.done.wait [#allocation4], 256  }
0x109b   :  { %2619 = vsyncadd [#allocation4], 4294967040 }
0x109c   :  { %2188 = vsyncpa [#allocation3], 1 }
0x109d   :  { %2189 = vsyncpa [#allocation6], 1 }
0x109e   :  { %2190 = vsyncpa [#allocation4], 1 }

</bundles_post_ra>
